<compile_context>
chip_gen: v6e
topology: v6e:2x2x1
jax: 0.10.0
libtpu: 0.0.40
codegen_flags: <defaults>
</compile_context>

<pallas_src>
import functools
import math

import jax
import jax.numpy as jnp
from jax.experimental import pallas as pl
from jax.experimental.pallas import tpu as pltpu

_EPS = 1e-10

# Lanczos (g=7, n=9) coefficients for lgamma of strictly-positive arguments.
_LANCZOS_G = 7.0
_LANCZOS_COEF = (
    0.99999999999980993,
    676.5203681218851,
    -1259.1392167224028,
    771.32342877765313,
    -176.61502916214059,
    12.507343278686905,
    -0.13857109526572012,
    9.9843695780195716e-6,
    1.5056327351493116e-7,
)
_HALF_LOG_2PI = 0.5 * math.log(2.0 * math.pi)

# Rational form of the Lanczos series:
#   A(z) = c0 + sum_i c_i/(z+i) = P(z) / ((z+1) * Q7(z)),
# with P degree-8 and Q7(z) = prod_{i=2..8}(z+i) degree-7.  The (z+1) factor
# is kept exact (it is just the lgamma argument), which keeps the form
# accurate for tiny arguments (disp -> 0).  Polynomials are evaluated in
# u = z/_SCALE (power of two -> exact coefficient rescale) so nothing leaves
# the f32 exponent range for counts up to ~1e6.
_SCALE = 256.0


def _poly_mul(a, b):
    out = [0.0] * (len(a) + len(b) - 1)
    for i, ai in enumerate(a):
        for j, bj in enumerate(b):
            out[i + j] += ai * bj
    return out


def _build_rational_lanczos(scale):
    q7 = [1.0]
    for i in range(2, 9):
        q7 = _poly_mul(q7, [float(i), 1.0])          # prod_{i=2..8}(z+i)
    p = [_LANCZOS_COEF[0] * c for c in _poly_mul([1.0, 1.0], q7)]  # c0*(z+1)*Q7
    for i in range(1, 9):
        r = [1.0]
        for j in range(1, 9):
            if j != i:
                r = _poly_mul(r, [float(j), 1.0])    # prod_{j!=i}(z+j)
        for k, rk in enumerate(r):
            p[k] += _LANCZOS_COEF[i] * rk
    p_hat = tuple(p[k] * scale ** (k - 8) for k in range(9))
    q7_hat = tuple(q7[k] * scale ** (k - 7) for k in range(8))
    return p_hat, q7_hat


_P_HAT, _Q7_HAT = _build_rational_lanczos(_SCALE)
_INV_SCALE = 1.0 / _SCALE


def _horner(coeffs, u):
    acc = coeffs[-1] * u + coeffs[-2]
    for c in coeffs[-3::-1]:
        acc = acc * u + c
    return acc


def _lanczos_num_den(arg):
    """Return (num, den) with num/den == Lanczos sum A(arg - 1), arg > 0."""
    u = (arg - 1.0) * _INV_SCALE
    num = _SCALE * _horner(_P_HAT, u)    # = P(z) / _SCALE**7
    den = arg * _horner(_Q7_HAT, u)      # = (z+1)*Q7(z) / _SCALE**7
    return num, den


def _zinb_kernel(x_ref, mean_ref, disp_ref, pi_ref, sf_ref, out_ref, *,
                 ridge_lambda, n_rows, n_cols, tm, tg, mask_rows, mask_cols):
    f32 = jnp.float32
    x = x_ref[...].astype(f32)
    disp = disp_ref[...].astype(f32)
    pi = pi_ref[...].astype(f32)
    sf = sf_ref[...].astype(f32)               # (tm, 1)
    mean = mean_ref[...].astype(f32) * sf      # broadcast over genes

    # ---- t1 = lgamma(disp+eps) + lgamma(x+1) - lgamma(x+disp+eps) ----------
    a = disp + _EPS
    b = x + 1.0
    c = x + disp + _EPS
    na, da = _lanczos_num_den(a)
    nb, db = _lanczos_num_den(b)
    nc, dc = _lanczos_num_den(c)
    # log(Aa*Ab/Ac) with a single log; form the three ratios first so the
    # intermediates stay inside the f32 range (counts up to ~1e6 are safe).
    ratio = (na / da) * (nb / db) * (dc / nc)
    # The linear "-t" pieces of the three lgammas collapse to -(g + 0.5).
    t1 = (_HALF_LOG_2PI - (_LANCZOS_G + 0.5)
          + (a - 0.5) * jnp.log(a + (_LANCZOS_G - 0.5))
          + (b - 0.5) * jnp.log(b + (_LANCZOS_G - 0.5))
          - (c - 0.5) * jnp.log(c + (_LANCZOS_G - 0.5))
          + jnp.log(ratio))

    # ---- t2 with CSE'd logs: log(1 + mean/(disp+eps)) == ldm - ld ----------
    ld = jnp.log(disp + _EPS)
    lm = jnp.log(mean + _EPS)
    ldm = jnp.log(disp + mean + _EPS)
    t2 = (disp + x) * (ldm - ld) + x * (ld - lm)

    nb_final = t1 + t2
    nb_final = jnp.where(jnp.isnan(nb_final), jnp.inf, nb_final)
    nb_case = nb_final - jnp.log(1.0 - pi + _EPS)

    # zero_nb = (disp/(disp+mean+eps))**disp.  Using ld = log(disp+eps) makes
    # disp == 0 yield exp(0) == 1, matching pow(0, 0) == 1 in the reference.
    zero_nb = jnp.exp(disp * (ld - ldm))
    zero_case = -jnp.log(pi + (1.0 - pi) * zero_nb + _EPS)

    result = jnp.where(x <= 1e-8, zero_case, nb_case)
    if ridge_lambda > 0:
        result = result + ridge_lambda * jnp.square(pi)

    # ---- mask out padded rows/cols (only when the wrapper padded) ----------
    if mask_rows or mask_cols:
        valid = None
        if mask_rows:
            rows = (jax.lax.broadcasted_iota(jnp.int32, (tm, tg), 0)
                    + pl.program_id(0) * tm)
            valid = rows < n_rows
        if mask_cols:
            cols = (jax.lax.broadcasted_iota(jnp.int32, (tm, tg), 1)
                    + pl.program_id(1) * tg)
            cmask = cols < n_cols
            valid = cmask if valid is None else jnp.logical_and(valid, cmask)
        result = jnp.where(valid, result, 0.0)

    # ---- lane-dense fold (tm, tg) -> (8, 128): pure VPU adds, no XLU -------
    row_fold = jnp.zeros((8, tg), f32)
    for r in range(0, tm, 8):
        row_fold = row_fold + result[r:r + 8, :]
    partial = jnp.zeros((8, 128), f32)
    for col in range(0, tg, 128):
        partial = partial + row_fold[:, col:col + 128]
    out_ref[...] = partial.reshape(1, 1, 8, 128)


def _round_up(v, m):
    return ((v + m - 1) // m) * m


def _vmem_capacity_bytes():
    try:
        info = pltpu.get_tpu_info()
        cap = getattr(info, "vmem_capacity_bytes", None)
        if cap:
            return int(cap)
    except Exception:
        pass
    return 64 * 1024 * 1024   # conservative default (v7x: 64 MiB per core)


def _pick_tiles(n, g):
    """Pick (tm, tg, n_pad, g_pad, vmem_limit) sized from the VMEM budget."""
    vmem_cap = _vmem_capacity_bytes()
    budget = int(0.4 * vmem_cap)          # for double-buffered input tiles

    # Gene tile: multiple of 128 that divides the (128-padded) gene count.
    g_pad = _round_up(g, 128)
    tg = 128
    d = 128
    while d <= min(g_pad, 2048):
        if g_pad % d == 0:
            tg = d
        d += 128

    # Row tile: as many rows as fit the budget (4 dense inputs + sf column,
    # f32, double-buffered), capped to keep the unrolled fold loop short.
    bytes_per_row = (4 * tg + 1) * 4 * 2
    tm = max(8, min(budget // bytes_per_row, 1024) // 8 * 8)
    tm = min(tm, _round_up(n, 8))
    n_pad = _round_up(n, tm)

    tile_bytes = (4 * tm * tg + tm) * 4 * 2 + 8 * 128 * 4 * 2
    vmem_limit = int(min(vmem_cap - (4 << 20), tile_bytes + (16 << 20)))
    vmem_limit = max(vmem_limit, 16 << 20)
    return tm, tg, n_pad, g_pad, vmem_limit


def zinb_loss(x, mean, disp, pi, scale_factor, ridge_lambda=1.0):
    """Pallas TPU implementation of ZINBLoss.forward. Returns an f32 scalar."""
    n, g = x.shape
    scale_factor = jnp.reshape(scale_factor, (n, 1))

    tm, tg, n_pad, g_pad, vmem_limit = _pick_tiles(n, g)
    mask_rows = n_pad != n
    mask_cols = g_pad != g

    def pad2(arr, cols):
        pr, pc = n_pad - arr.shape[0], cols - arr.shape[1]
        if pr or pc:
            arr = jnp.pad(arr, ((0, pr), (0, pc)))
        return arr

    xp = pad2(x, g_pad)
    meanp = pad2(mean, g_pad)
    dispp = pad2(disp, g_pad)
    pip = pad2(pi, g_pad)
    sfp = pad2(scale_factor, 1)

    kernel = functools.partial(
        _zinb_kernel, ridge_lambda=float(ridge_lambda), n_rows=n, n_cols=g,
        tm=tm, tg=tg, mask_rows=mask_rows, mask_cols=mask_cols)

    grid = (n_pad // tm, g_pad // tg)
    tile_spec = pl.BlockSpec((tm, tg), lambda i, j: (i, j))
    sf_spec = pl.BlockSpec((tm, 1), lambda i, j: (i, 0))
    out_spec = pl.BlockSpec((1, 1, 8, 128), lambda i, j: (i, j, 0, 0))

    partials = pl.pallas_call(
        kernel,
        out_shape=jax.ShapeDtypeStruct((grid[0], grid[1], 8, 128), jnp.float32),
        grid_spec=pltpu.PrefetchScalarGridSpec(
            num_scalar_prefetch=0,
            grid=grid,
            in_specs=[tile_spec, tile_spec, tile_spec, tile_spec, sf_spec],
            out_specs=out_spec,
        ),
        compiler_params=pltpu.CompilerParams(
            dimension_semantics=("parallel", "parallel"),
            vmem_limit_bytes=vmem_limit),
    )(xp, meanp, dispp, pip, sfp)

    result = jnp.sum(partials) / jnp.float32(n * g)      # torch.mean
    return jnp.where(jnp.isnan(result), jnp.inf, result)


def _zinb_loss_ref(x, mean, disp, pi, scale_factor, ridge_lambda=1.0):
    """Pure-JAX reference mirroring the PyTorch forward."""
    eps = _EPS
    g = mean.shape[1]
    sf = jnp.matmul(scale_factor, jnp.ones((1, g), mean.dtype))
    mean = mean * sf
    t1 = (jax.lax.lgamma(disp + eps) + jax.lax.lgamma(x + 1.0)
          - jax.lax.lgamma(x + disp + eps))
    t2 = ((disp + x) * jnp.log(1.0 + mean / (disp + eps))
          + x * (jnp.log(disp + eps) - jnp.log(mean + eps)))
    nb_final = t1 + t2
    nb_final = jnp.where(jnp.isnan(nb_final), jnp.inf, nb_final)
    nb_case = nb_final - jnp.log(1.0 - pi + eps)
    zero_nb = jnp.power(disp / (disp + mean + eps), disp)
    zero_case = -jnp.log(pi + (1.0 - pi) * zero_nb + eps)
    result = jnp.where(x <= 1e-8, zero_case, nb_case)
    if ridge_lambda > 0:
        result = result + ridge_lambda * jnp.square(pi)
    result = jnp.mean(result)
    return jnp.where(jnp.isnan(result), jnp.inf, result)


def _make_inputs(key, n, g):
    kx, km, kd, kp, ks = jax.random.split(key, 5)
    x = jnp.floor(jax.random.exponential(kx, (n, g), dtype=jnp.float32) * 2.0)
    mean = jax.random.uniform(km, (n, g), jnp.float32, 0.1, 5.0)
    disp = jax.random.uniform(kd, (n, g), jnp.float32, 0.5, 3.0)
    pi = jax.random.uniform(kp, (n, g), jnp.float32, 0.05, 0.9)
    scale_factor = jax.random.uniform(ks, (n, 1), jnp.float32, 0.5, 2.0)
    return x, mean, disp, pi, scale_factor


if __name__ == "__main__":
    key = jax.random.PRNGKey(0)

    # Aligned case (no padding / masking).
    N, G = 16, 256
    args = _make_inputs(key, N, G)
    out = jax.block_until_ready(zinb_loss(*args, ridge_lambda=1.0))
    ref = _zinb_loss_ref(*args, ridge_lambda=1.0)
    assert jnp.isfinite(out), f"non-finite kernel output: {out}"
    assert abs(float(out) - float(ref)) <= 2e-3 * (abs(float(ref)) + 1.0), (
        f"mismatch: kernel={float(out)} ref={float(ref)}")

    # Ragged case (exercises the pad + in-kernel mask path).
    N2, G2 = 12, 200
    args2 = _make_inputs(jax.random.PRNGKey(1), N2, G2)
    out2 = jax.block_until_ready(zinb_loss(*args2, ridge_lambda=1.0))
    ref2 = _zinb_loss_ref(*args2, ridge_lambda=1.0)
    assert jnp.isfinite(out2), f"non-finite kernel output: {out2}"
    assert abs(float(out2) - float(ref2)) <= 2e-3 * (abs(float(ref2)) + 1.0), (
        f"mismatch (ragged): kernel={float(out2)} ref={float(ref2)}")

    print("KERNEL_OK")
</pallas_src>

<mosaic_0001>
module attributes {stable_mosaic.version = 11 : i64} {
  func.func @_zinb_kernel(%arg0: i32, %arg1: i32, %arg2: memref<16x256xf32, #tpu.memory_space<vmem>>, %arg3: memref<16x256xf32, #tpu.memory_space<vmem>>, %arg4: memref<16x256xf32, #tpu.memory_space<vmem>>, %arg5: memref<16x256xf32, #tpu.memory_space<vmem>>, %arg6: memref<16x1xf32, #tpu.memory_space<vmem>>, %arg7: memref<1x1x8x128xf32, #tpu.memory_space<vmem>>) attributes {dimension_semantics = [#tpu.dimension_semantics<parallel>, #tpu.dimension_semantics<parallel>], iteration_bounds = array<i64: 1, 1>, scalar_prefetch = 0 : i64, scratch_operands = 0 : i64, tpu.core_type = #tpu.core_type<tc>, window_params = [{transform_indices = @transform_0, window_bounds = array<i64: 16, 256>}, {transform_indices = @transform_1, window_bounds = array<i64: 16, 256>}, {transform_indices = @transform_2, window_bounds = array<i64: 16, 256>}, {transform_indices = @transform_3, window_bounds = array<i64: 16, 256>}, {transform_indices = @transform_4, window_bounds = array<i64: 16, 1>}, {transform_indices = @transform_5, window_bounds = array<i64: 1, 1, 8, 128>}]} {
    %c0 = arith.constant 0 : index
    %c0_0 = arith.constant 0 : index
    %0 = vector.load %arg2[%c0, %c0_0] : memref<16x256xf32, #tpu.memory_space<vmem>>, vector<16x256xf32>
    %c0_1 = arith.constant 0 : index
    %c0_2 = arith.constant 0 : index
    %1 = vector.load %arg4[%c0_1, %c0_2] : memref<16x256xf32, #tpu.memory_space<vmem>>, vector<16x256xf32>
    %c0_3 = arith.constant 0 : index
    %c0_4 = arith.constant 0 : index
    %2 = vector.load %arg5[%c0_3, %c0_4] : memref<16x256xf32, #tpu.memory_space<vmem>>, vector<16x256xf32>
    %c0_5 = arith.constant 0 : index
    %c0_6 = arith.constant 0 : index
    %3 = vector.load %arg6[%c0_5, %c0_6] : memref<16x1xf32, #tpu.memory_space<vmem>>, vector<16x1xf32>
    %c0_7 = arith.constant 0 : index
    %c0_8 = arith.constant 0 : index
    %4 = vector.load %arg3[%c0_7, %c0_8] : memref<16x256xf32, #tpu.memory_space<vmem>>, vector<16x256xf32>
    %5 = vector.broadcast %3 : vector<16x1xf32> to vector<16x256xf32>
    %6 = arith.mulf %4, %5 : vector<16x256xf32>
    %cst = arith.constant 1.000000e-10 : f32
    %7 = vector.broadcast %cst : f32 to vector<16x256xf32>
    %8 = arith.addf %1, %7 : vector<16x256xf32>
    %cst_9 = arith.constant 1.000000e+00 : f32
    %9 = vector.broadcast %cst_9 : f32 to vector<16x256xf32>
    %10 = arith.addf %0, %9 : vector<16x256xf32>
    %11 = arith.addf %0, %1 : vector<16x256xf32>
    %cst_10 = arith.constant 1.000000e-10 : f32
    %12 = vector.broadcast %cst_10 : f32 to vector<16x256xf32>
    %13 = arith.addf %11, %12 : vector<16x256xf32>
    %cst_11 = arith.constant 1.000000e+00 : f32
    %14 = vector.broadcast %cst_11 : f32 to vector<16x256xf32>
    %15 = arith.subf %8, %14 : vector<16x256xf32>
    %cst_12 = arith.constant 3.906250e-03 : f32
    %16 = vector.broadcast %cst_12 : f32 to vector<16x256xf32>
    %17 = arith.mulf %15, %16 : vector<16x256xf32>
    %cst_13 = arith.constant 1.000000e+00 : f32
    %18 = vector.broadcast %cst_13 : f32 to vector<16x256xf32>
    %19 = arith.mulf %18, %17 : vector<16x256xf32>
    %cst_14 = arith.constant 0.23616536 : f32
    %20 = vector.broadcast %cst_14 : f32 to vector<16x256xf32>
    %21 = arith.addf %19, %20 : vector<16x256xf32>
    %22 = arith.mulf %21, %17 : vector<16x256xf32>
    %cst_15 = arith.constant 0.0243994519 : f32
    %23 = vector.broadcast %cst_15 : f32 to vector<16x256xf32>
    %24 = arith.addf %22, %23 : vector<16x256xf32>
    %25 = arith.mulf %24, %17 : vector<16x256xf32>
    %cst_16 = arith.constant 0.00144037663 : f32
    %26 = vector.broadcast %cst_16 : f32 to vector<16x256xf32>
    %27 = arith.addf %25, %26 : vector<16x256xf32>
    %28 = arith.mulf %27, %17 : vector<16x256xf32>
    %cst_17 = arith.constant 5.31401529E-5 : f32
    %29 = vector.broadcast %cst_17 : f32 to vector<16x256xf32>
    %30 = arith.addf %28, %29 : vector<16x256xf32>
    %31 = arith.mulf %30, %17 : vector<16x256xf32>
    %cst_18 = arith.constant 1.25464453E-6 : f32
    %32 = vector.broadcast %cst_18 : f32 to vector<16x256xf32>
    %33 = arith.addf %31, %32 : vector<16x256xf32>
    %34 = arith.mulf %33, %17 : vector<16x256xf32>
    %cst_19 = arith.constant 1.85127256E-8 : f32
    %35 = vector.broadcast %cst_19 : f32 to vector<16x256xf32>
    %36 = arith.addf %34, %35 : vector<16x256xf32>
    %37 = arith.mulf %36, %17 : vector<16x256xf32>
    %cst_20 = arith.constant 1.56082494E-10 : f32
    %38 = vector.broadcast %cst_20 : f32 to vector<16x256xf32>
    %39 = arith.addf %37, %38 : vector<16x256xf32>
    %40 = arith.mulf %39, %17 : vector<16x256xf32>
    %cst_21 = arith.constant 5.75690212E-13 : f32
    %41 = vector.broadcast %cst_21 : f32 to vector<16x256xf32>
    %42 = arith.addf %40, %41 : vector<16x256xf32>
    %cst_22 = arith.constant 2.560000e+02 : f32
    %43 = vector.broadcast %cst_22 : f32 to vector<16x256xf32>
    %44 = arith.mulf %43, %42 : vector<16x256xf32>
    %cst_23 = arith.constant 1.000000e+00 : f32
    %45 = vector.broadcast %cst_23 : f32 to vector<16x256xf32>
    %46 = arith.mulf %45, %17 : vector<16x256xf32>
    %cst_24 = arith.constant 0.13671875 : f32
    %47 = vector.broadcast %cst_24 : f32 to vector<16x256xf32>
    %48 = arith.addf %46, %47 : vector<16x256xf32>
    %49 = arith.mulf %48, %17 : vector<16x256xf32>
    %cst_25 = arith.constant 0.00779724121 : f32
    %50 = vector.broadcast %cst_25 : f32 to vector<16x256xf32>
    %51 = arith.addf %49, %50 : vector<16x256xf32>
    %52 = arith.mulf %51, %17 : vector<16x256xf32>
    %cst_26 = arith.constant 2.39908695E-4 : f32
    %53 = vector.broadcast %cst_26 : f32 to vector<16x256xf32>
    %54 = arith.addf %52, %53 : vector<16x256xf32>
    %55 = arith.mulf %54, %17 : vector<16x256xf32>
    %cst_27 = arith.constant 4.28967178E-6 : f32
    %56 = vector.broadcast %cst_27 : f32 to vector<16x256xf32>
    %57 = arith.addf %55, %56 : vector<16x256xf32>
    %58 = arith.mulf %57, %17 : vector<16x256xf32>
    %cst_28 = arith.constant 4.44379111E-8 : f32
    %59 = vector.broadcast %cst_28 : f32 to vector<16x256xf32>
    %60 = arith.addf %58, %59 : vector<16x256xf32>
    %61 = arith.mulf %60, %17 : vector<16x256xf32>
    %cst_29 = arith.constant 2.4607516E-10 : f32
    %62 = vector.broadcast %cst_29 : f32 to vector<16x256xf32>
    %63 = arith.addf %61, %62 : vector<16x256xf32>
    %64 = arith.mulf %63, %17 : vector<16x256xf32>
    %cst_30 = arith.constant 5.59552404E-13 : f32
    %65 = vector.broadcast %cst_30 : f32 to vector<16x256xf32>
    %66 = arith.addf %64, %65 : vector<16x256xf32>
    %67 = arith.mulf %8, %66 : vector<16x256xf32>
    %cst_31 = arith.constant 1.000000e+00 : f32
    %68 = vector.broadcast %cst_31 : f32 to vector<16x256xf32>
    %69 = arith.subf %10, %68 : vector<16x256xf32>
    %cst_32 = arith.constant 3.906250e-03 : f32
    %70 = vector.broadcast %cst_32 : f32 to vector<16x256xf32>
    %71 = arith.mulf %69, %70 : vector<16x256xf32>
    %cst_33 = arith.constant 1.000000e+00 : f32
    %72 = vector.broadcast %cst_33 : f32 to vector<16x256xf32>
    %73 = arith.mulf %72, %71 : vector<16x256xf32>
    %cst_34 = arith.constant 0.23616536 : f32
    %74 = vector.broadcast %cst_34 : f32 to vector<16x256xf32>
    %75 = arith.addf %73, %74 : vector<16x256xf32>
    %76 = arith.mulf %75, %71 : vector<16x256xf32>
    %cst_35 = arith.constant 0.0243994519 : f32
    %77 = vector.broadcast %cst_35 : f32 to vector<16x256xf32>
    %78 = arith.addf %76, %77 : vector<16x256xf32>
    %79 = arith.mulf %78, %71 : vector<16x256xf32>
    %cst_36 = arith.constant 0.00144037663 : f32
    %80 = vector.broadcast %cst_36 : f32 to vector<16x256xf32>
    %81 = arith.addf %79, %80 : vector<16x256xf32>
    %82 = arith.mulf %81, %71 : vector<16x256xf32>
    %cst_37 = arith.constant 5.31401529E-5 : f32
    %83 = vector.broadcast %cst_37 : f32 to vector<16x256xf32>
    %84 = arith.addf %82, %83 : vector<16x256xf32>
    %85 = arith.mulf %84, %71 : vector<16x256xf32>
    %cst_38 = arith.constant 1.25464453E-6 : f32
    %86 = vector.broadcast %cst_38 : f32 to vector<16x256xf32>
    %87 = arith.addf %85, %86 : vector<16x256xf32>
    %88 = arith.mulf %87, %71 : vector<16x256xf32>
    %cst_39 = arith.constant 1.85127256E-8 : f32
    %89 = vector.broadcast %cst_39 : f32 to vector<16x256xf32>
    %90 = arith.addf %88, %89 : vector<16x256xf32>
    %91 = arith.mulf %90, %71 : vector<16x256xf32>
    %cst_40 = arith.constant 1.56082494E-10 : f32
    %92 = vector.broadcast %cst_40 : f32 to vector<16x256xf32>
    %93 = arith.addf %91, %92 : vector<16x256xf32>
    %94 = arith.mulf %93, %71 : vector<16x256xf32>
    %cst_41 = arith.constant 5.75690212E-13 : f32
    %95 = vector.broadcast %cst_41 : f32 to vector<16x256xf32>
    %96 = arith.addf %94, %95 : vector<16x256xf32>
    %cst_42 = arith.constant 2.560000e+02 : f32
    %97 = vector.broadcast %cst_42 : f32 to vector<16x256xf32>
    %98 = arith.mulf %97, %96 : vector<16x256xf32>
    %cst_43 = arith.constant 1.000000e+00 : f32
    %99 = vector.broadcast %cst_43 : f32 to vector<16x256xf32>
    %100 = arith.mulf %99, %71 : vector<16x256xf32>
    %cst_44 = arith.constant 0.13671875 : f32
    %101 = vector.broadcast %cst_44 : f32 to vector<16x256xf32>
    %102 = arith.addf %100, %101 : vector<16x256xf32>
    %103 = arith.mulf %102, %71 : vector<16x256xf32>
    %cst_45 = arith.constant 0.00779724121 : f32
    %104 = vector.broadcast %cst_45 : f32 to vector<16x256xf32>
    %105 = arith.addf %103, %104 : vector<16x256xf32>
    %106 = arith.mulf %105, %71 : vector<16x256xf32>
    %cst_46 = arith.constant 2.39908695E-4 : f32
    %107 = vector.broadcast %cst_46 : f32 to vector<16x256xf32>
    %108 = arith.addf %106, %107 : vector<16x256xf32>
    %109 = arith.mulf %108, %71 : vector<16x256xf32>
    %cst_47 = arith.constant 4.28967178E-6 : f32
    %110 = vector.broadcast %cst_47 : f32 to vector<16x256xf32>
    %111 = arith.addf %109, %110 : vector<16x256xf32>
    %112 = arith.mulf %111, %71 : vector<16x256xf32>
    %cst_48 = arith.constant 4.44379111E-8 : f32
    %113 = vector.broadcast %cst_48 : f32 to vector<16x256xf32>
    %114 = arith.addf %112, %113 : vector<16x256xf32>
    %115 = arith.mulf %114, %71 : vector<16x256xf32>
    %cst_49 = arith.constant 2.4607516E-10 : f32
    %116 = vector.broadcast %cst_49 : f32 to vector<16x256xf32>
    %117 = arith.addf %115, %116 : vector<16x256xf32>
    %118 = arith.mulf %117, %71 : vector<16x256xf32>
    %cst_50 = arith.constant 5.59552404E-13 : f32
    %119 = vector.broadcast %cst_50 : f32 to vector<16x256xf32>
    %120 = arith.addf %118, %119 : vector<16x256xf32>
    %121 = arith.mulf %10, %120 : vector<16x256xf32>
    %cst_51 = arith.constant 1.000000e+00 : f32
    %122 = vector.broadcast %cst_51 : f32 to vector<16x256xf32>
    %123 = arith.subf %13, %122 : vector<16x256xf32>
    %cst_52 = arith.constant 3.906250e-03 : f32
    %124 = vector.broadcast %cst_52 : f32 to vector<16x256xf32>
    %125 = arith.mulf %123, %124 : vector<16x256xf32>
    %cst_53 = arith.constant 1.000000e+00 : f32
    %126 = vector.broadcast %cst_53 : f32 to vector<16x256xf32>
    %127 = arith.mulf %126, %125 : vector<16x256xf32>
    %cst_54 = arith.constant 0.23616536 : f32
    %128 = vector.broadcast %cst_54 : f32 to vector<16x256xf32>
    %129 = arith.addf %127, %128 : vector<16x256xf32>
    %130 = arith.mulf %129, %125 : vector<16x256xf32>
    %cst_55 = arith.constant 0.0243994519 : f32
    %131 = vector.broadcast %cst_55 : f32 to vector<16x256xf32>
    %132 = arith.addf %130, %131 : vector<16x256xf32>
    %133 = arith.mulf %132, %125 : vector<16x256xf32>
    %cst_56 = arith.constant 0.00144037663 : f32
    %134 = vector.broadcast %cst_56 : f32 to vector<16x256xf32>
    %135 = arith.addf %133, %134 : vector<16x256xf32>
    %136 = arith.mulf %135, %125 : vector<16x256xf32>
    %cst_57 = arith.constant 5.31401529E-5 : f32
    %137 = vector.broadcast %cst_57 : f32 to vector<16x256xf32>
    %138 = arith.addf %136, %137 : vector<16x256xf32>
    %139 = arith.mulf %138, %125 : vector<16x256xf32>
    %cst_58 = arith.constant 1.25464453E-6 : f32
    %140 = vector.broadcast %cst_58 : f32 to vector<16x256xf32>
    %141 = arith.addf %139, %140 : vector<16x256xf32>
    %142 = arith.mulf %141, %125 : vector<16x256xf32>
    %cst_59 = arith.constant 1.85127256E-8 : f32
    %143 = vector.broadcast %cst_59 : f32 to vector<16x256xf32>
    %144 = arith.addf %142, %143 : vector<16x256xf32>
    %145 = arith.mulf %144, %125 : vector<16x256xf32>
    %cst_60 = arith.constant 1.56082494E-10 : f32
    %146 = vector.broadcast %cst_60 : f32 to vector<16x256xf32>
    %147 = arith.addf %145, %146 : vector<16x256xf32>
    %148 = arith.mulf %147, %125 : vector<16x256xf32>
    %cst_61 = arith.constant 5.75690212E-13 : f32
    %149 = vector.broadcast %cst_61 : f32 to vector<16x256xf32>
    %150 = arith.addf %148, %149 : vector<16x256xf32>
    %cst_62 = arith.constant 2.560000e+02 : f32
    %151 = vector.broadcast %cst_62 : f32 to vector<16x256xf32>
    %152 = arith.mulf %151, %150 : vector<16x256xf32>
    %cst_63 = arith.constant 1.000000e+00 : f32
    %153 = vector.broadcast %cst_63 : f32 to vector<16x256xf32>
    %154 = arith.mulf %153, %125 : vector<16x256xf32>
    %cst_64 = arith.constant 0.13671875 : f32
    %155 = vector.broadcast %cst_64 : f32 to vector<16x256xf32>
    %156 = arith.addf %154, %155 : vector<16x256xf32>
    %157 = arith.mulf %156, %125 : vector<16x256xf32>
    %cst_65 = arith.constant 0.00779724121 : f32
    %158 = vector.broadcast %cst_65 : f32 to vector<16x256xf32>
    %159 = arith.addf %157, %158 : vector<16x256xf32>
    %160 = arith.mulf %159, %125 : vector<16x256xf32>
    %cst_66 = arith.constant 2.39908695E-4 : f32
    %161 = vector.broadcast %cst_66 : f32 to vector<16x256xf32>
    %162 = arith.addf %160, %161 : vector<16x256xf32>
    %163 = arith.mulf %162, %125 : vector<16x256xf32>
    %cst_67 = arith.constant 4.28967178E-6 : f32
    %164 = vector.broadcast %cst_67 : f32 to vector<16x256xf32>
    %165 = arith.addf %163, %164 : vector<16x256xf32>
    %166 = arith.mulf %165, %125 : vector<16x256xf32>
    %cst_68 = arith.constant 4.44379111E-8 : f32
    %167 = vector.broadcast %cst_68 : f32 to vector<16x256xf32>
    %168 = arith.addf %166, %167 : vector<16x256xf32>
    %169 = arith.mulf %168, %125 : vector<16x256xf32>
    %cst_69 = arith.constant 2.4607516E-10 : f32
    %170 = vector.broadcast %cst_69 : f32 to vector<16x256xf32>
    %171 = arith.addf %169, %170 : vector<16x256xf32>
    %172 = arith.mulf %171, %125 : vector<16x256xf32>
    %cst_70 = arith.constant 5.59552404E-13 : f32
    %173 = vector.broadcast %cst_70 : f32 to vector<16x256xf32>
    %174 = arith.addf %172, %173 : vector<16x256xf32>
    %175 = arith.mulf %13, %174 : vector<16x256xf32>
    %176 = arith.divf %44, %67 : vector<16x256xf32>
    %177 = arith.divf %98, %121 : vector<16x256xf32>
    %178 = arith.mulf %176, %177 : vector<16x256xf32>
    %179 = arith.divf %175, %152 : vector<16x256xf32>
    %180 = arith.mulf %178, %179 : vector<16x256xf32>
    %cst_71 = arith.constant 5.000000e-01 : f32
    %181 = vector.broadcast %cst_71 : f32 to vector<16x256xf32>
    %182 = arith.subf %8, %181 : vector<16x256xf32>
    %cst_72 = arith.constant 6.500000e+00 : f32
    %183 = vector.broadcast %cst_72 : f32 to vector<16x256xf32>
    %184 = arith.addf %8, %183 : vector<16x256xf32>
    %185 = math.log %184 : vector<16x256xf32>
    %186 = arith.mulf %182, %185 : vector<16x256xf32>
    %cst_73 = arith.constant -6.58106136 : f32
    %187 = vector.broadcast %cst_73 : f32 to vector<16x256xf32>
    %188 = arith.addf %187, %186 : vector<16x256xf32>
    %cst_74 = arith.constant 5.000000e-01 : f32
    %189 = vector.broadcast %cst_74 : f32 to vector<16x256xf32>
    %190 = arith.subf %10, %189 : vector<16x256xf32>
    %cst_75 = arith.constant 6.500000e+00 : f32
    %191 = vector.broadcast %cst_75 : f32 to vector<16x256xf32>
    %192 = arith.addf %10, %191 : vector<16x256xf32>
    %193 = math.log %192 : vector<16x256xf32>
    %194 = arith.mulf %190, %193 : vector<16x256xf32>
    %195 = arith.addf %188, %194 : vector<16x256xf32>
    %cst_76 = arith.constant 5.000000e-01 : f32
    %196 = vector.broadcast %cst_76 : f32 to vector<16x256xf32>
    %197 = arith.subf %13, %196 : vector<16x256xf32>
    %cst_77 = arith.constant 6.500000e+00 : f32
    %198 = vector.broadcast %cst_77 : f32 to vector<16x256xf32>
    %199 = arith.addf %13, %198 : vector<16x256xf32>
    %200 = math.log %199 : vector<16x256xf32>
    %201 = arith.mulf %197, %200 : vector<16x256xf32>
    %202 = arith.subf %195, %201 : vector<16x256xf32>
    %203 = math.log %180 : vector<16x256xf32>
    %204 = arith.addf %202, %203 : vector<16x256xf32>
    %cst_78 = arith.constant 1.000000e-10 : f32
    %205 = vector.broadcast %cst_78 : f32 to vector<16x256xf32>
    %206 = arith.addf %1, %205 : vector<16x256xf32>
    %207 = math.log %206 : vector<16x256xf32>
    %cst_79 = arith.constant 1.000000e-10 : f32
    %208 = vector.broadcast %cst_79 : f32 to vector<16x256xf32>
    %209 = arith.addf %6, %208 : vector<16x256xf32>
    %210 = math.log %209 : vector<16x256xf32>
    %211 = arith.addf %1, %6 : vector<16x256xf32>
    %cst_80 = arith.constant 1.000000e-10 : f32
    %212 = vector.broadcast %cst_80 : f32 to vector<16x256xf32>
    %213 = arith.addf %211, %212 : vector<16x256xf32>
    %214 = math.log %213 : vector<16x256xf32>
    %215 = arith.addf %1, %0 : vector<16x256xf32>
    %216 = arith.subf %214, %207 : vector<16x256xf32>
    %217 = arith.mulf %215, %216 : vector<16x256xf32>
    %218 = arith.subf %207, %210 : vector<16x256xf32>
    %219 = arith.mulf %0, %218 : vector<16x256xf32>
    %220 = arith.addf %217, %219 : vector<16x256xf32>
    %221 = arith.addf %204, %220 : vector<16x256xf32>
    %222 = arith.cmpf one, %221, %221 : vector<16x256xf32>
    %cst_81 = arith.constant 0x7F800000 : f32
    %223 = vector.broadcast %cst_81 : f32 to vector<16x256xf32>
    %224 = arith.select %222, %223, %221 : vector<16x256xi1>, vector<16x256xf32>
    %cst_82 = arith.constant 1.000000e+00 : f32
    %225 = vector.broadcast %cst_82 : f32 to vector<16x256xf32>
    %226 = arith.subf %225, %2 : vector<16x256xf32>
    %cst_83 = arith.constant 1.000000e-10 : f32
    %227 = vector.broadcast %cst_83 : f32 to vector<16x256xf32>
    %228 = arith.addf %226, %227 : vector<16x256xf32>
    %229 = math.log %228 : vector<16x256xf32>
    %230 = arith.subf %224, %229 : vector<16x256xf32>
    %231 = arith.subf %207, %214 : vector<16x256xf32>
    %232 = arith.mulf %1, %231 : vector<16x256xf32>
    %233 = math.exp %232 : vector<16x256xf32>
    %cst_84 = arith.constant 1.000000e+00 : f32
    %234 = vector.broadcast %cst_84 : f32 to vector<16x256xf32>
    %235 = arith.subf %234, %2 : vector<16x256xf32>
    %236 = arith.mulf %235, %233 : vector<16x256xf32>
    %237 = arith.addf %2, %236 : vector<16x256xf32>
    %cst_85 = arith.constant 1.000000e-10 : f32
    %238 = vector.broadcast %cst_85 : f32 to vector<16x256xf32>
    %239 = arith.addf %237, %238 : vector<16x256xf32>
    %240 = math.log %239 : vector<16x256xf32>
    %cst_86 = arith.constant 0.000000e+00 : f32
    %241 = vector.broadcast %cst_86 : f32 to vector<16x256xf32>
    %242 = arith.subf %241, %240 : vector<16x256xf32>
    %cst_87 = arith.constant 9.99999993E-9 : f32
    %243 = vector.broadcast %cst_87 : f32 to vector<16x256xf32>
    %244 = arith.cmpf ole, %0, %243 : vector<16x256xf32>
    %245 = arith.select %244, %242, %230 : vector<16x256xi1>, vector<16x256xf32>
    %246 = arith.mulf %2, %2 : vector<16x256xf32>
    %cst_88 = arith.constant 1.000000e+00 : f32
    %247 = vector.broadcast %cst_88 : f32 to vector<16x256xf32>
    %248 = arith.mulf %247, %246 : vector<16x256xf32>
    %249 = arith.addf %245, %248 : vector<16x256xf32>
    %cst_89 = arith.constant 0.000000e+00 : f32
    %250 = vector.broadcast %cst_89 : f32 to vector<8x256xf32>
    %251 = vector.extract_strided_slice %249 {offsets = [0, 0], sizes = [8, 256], strides = [1, 1]} : vector<16x256xf32> to vector<8x256xf32>
    %252 = arith.addf %250, %251 : vector<8x256xf32>
    %253 = vector.extract_strided_slice %249 {offsets = [8, 0], sizes = [8, 256], strides = [1, 1]} : vector<16x256xf32> to vector<8x256xf32>
    %254 = arith.addf %252, %253 : vector<8x256xf32>
    %cst_90 = arith.constant 0.000000e+00 : f32
    %255 = vector.broadcast %cst_90 : f32 to vector<8x128xf32>
    %256 = vector.extract_strided_slice %254 {offsets = [0, 0], sizes = [8, 128], strides = [1, 1]} : vector<8x256xf32> to vector<8x128xf32>
    %257 = arith.addf %255, %256 : vector<8x128xf32>
    %258 = vector.extract_strided_slice %254 {offsets = [0, 128], sizes = [8, 128], strides = [1, 1]} : vector<8x256xf32> to vector<8x128xf32>
    %259 = arith.addf %257, %258 : vector<8x128xf32>
    %260 = vector.shape_cast %259 : vector<8x128xf32> to vector<1x1x8x128xf32>
    %c0_91 = arith.constant 0 : index
    %c0_92 = arith.constant 0 : index
    %c0_93 = arith.constant 0 : index
    %c0_94 = arith.constant 0 : index
    %261 = vector.load %arg7[%c0_91, %c0_92, %c0_93, %c0_94] : memref<1x1x8x128xf32, #tpu.memory_space<vmem>>, vector<1x1x8x128xf32>
    tpu.vector_store %arg7[%c0_91, %c0_92, %c0_93, %c0_94], %260 {strides = array<i32>} : memref<1x1x8x128xf32, #tpu.memory_space<vmem>>, vector<1x1x8x128xf32>,
    return
  }
  func.func @transform_0(%arg0: i32, %arg1: i32) -> (i32, i32) {
    %c0_i32 = arith.constant 0 : i32
    return %arg0, %arg1 : i32, i32
  }
  func.func @transform_1(%arg0: i32, %arg1: i32) -> (i32, i32) {
    %c0_i32 = arith.constant 0 : i32
    return %arg0, %arg1 : i32, i32
  }
  func.func @transform_2(%arg0: i32, %arg1: i32) -> (i32, i32) {
    %c0_i32 = arith.constant 0 : i32
    return %arg0, %arg1 : i32, i32
  }
  func.func @transform_3(%arg0: i32, %arg1: i32) -> (i32, i32) {
    %c0_i32 = arith.constant 0 : i32
    return %arg0, %arg1 : i32, i32
  }
  func.func @transform_4(%arg0: i32, %arg1: i32) -> (i32, i32) {
    %c0_i32 = arith.constant 0 : i32
    %c0_i32_0 = arith.constant 0 : i32
    return %arg0, %c0_i32 : i32, i32
  }
  func.func @transform_5(%arg0: i32, %arg1: i32) -> (i32, i32, i32, i32) {
    %c0_i32 = arith.constant 0 : i32
    %c0_i32_0 = arith.constant 0 : i32
    %c0_i32_1 = arith.constant 0 : i32
    return %arg0, %arg1, %c0_i32, %c0_i32_0 : i32, i32, i32, i32
  }
}

</mosaic_0001>

<bundles_post_ra>
// kernel: tpu_custom_call.1
= control target key start
LH: loop header
LB: loop body
LE: loop exit
PB: predicated region body
PF: predicated region fallthrough
CT: control target
= control target key end

     0   :  { %10 = vsyncpa [#allocation3], 0  ;;  %s1628_s0 = inlined_call_operand.hbm [shape: f32[16,256], index: 0, kind: input, shape index: {}]   ;;  %s1629_s1 = inlined_call_operand.hbm [shape: f32[16,256], index: 1, kind: input, shape index: {}]   ;;  %s1630_s2 = inlined_call_operand.hbm [shape: f32[16,256], index: 2, kind: input, shape index: {}]   ;;  %s1631_s3 = inlined_call_operand.hbm [shape: f32[16,256], index: 3, kind: input, shape index: {}]   ;;  %s1632_s4 = inlined_call_operand.vmem [shape: f32[16,1], index: 4, kind: input, shape index: {}]   ;;  %s1633_s5 = inlined_call_operand.hbm [shape: f32[1,1,8,128], index: 5, kind: output, shape index: {}]  }
   0x1   :  { %11 = vsyncpa [#allocation6], 0 }
   0x2   :  { %12 = vsyncpa [#allocation9], 0 }
   0x3   :  { %13 = vsyncpa [#allocation4], 0  ;;  %s1045_s18 = smov [#allocation5]   ;;  %s1046_s20 = smov [#allocation2]  }
   0x4   :  { %s31_s19 = sshll.u32 %s1045_s18, 4  ;;  %s19_s21 = sshll.u32 %s1046_s20, 4  ;;  %s32_s19 = int_to_ptr.vmem [resolvable:$true] %s31_s19  ;;  %s20_s21 = int_to_ptr.vmem [resolvable:$true] %s19_s21 }
   0x5   :  { %s945_s22 = scalar_lea.vmem %s32_s19, 512  ;;  %p950_p1 = scmp.lt.s32.totalorder %s32_s19, %s32_s19 }
   0x6   :  { %p946_p0 = scmp.ne.s32.totalorder %s32_s19, %s945_s22  ;;  %p951_p2 = scmp.lt.s32.totalorder %s945_s22, %s945_s22 }
   0x8   :  { %p952_p3 = por %p951_p2, %p950_p1 }
   0xa   :  { %p953_p4 = pnand %p952_p3, %p946_p0 }
   0xc   :  { %956 = shalt.err (!%p953_p4)
}
   0xd   :  { %s1047_s23 = smov 256   ;;  %s1048_s24 = smov 16  }
   0xe   :  { %37 = dma.hbm_to_vmem [thread:$0]  %s1629_s1, 512, %s32_s19, [#allocation6], %s1047_s23, %s1047_s23, %s1048_s24  }
   0xf   :  { %s965_s27 = scalar_lea.vmem %s20_s21, 512  ;;  %p970_p6 = scmp.lt.s32.totalorder %s20_s21, %s20_s21 }
  0x10   :  { %p966_p5 = scmp.ne.s32.totalorder %s20_s21, %s965_s27  ;;  %p971_p7 = scmp.lt.s32.totalorder %s965_s27, %s965_s27 }
  0x12   :  { %p972_p8 = por %p971_p7, %p970_p6 }
  0x14   :  { %p973_p9 = pnand %p972_p8, %p966_p5 }
  0x16   :  { %976 = shalt.err (!%p973_p9)
}
  0x17   :  { %25 = dma.hbm_to_vmem [thread:$0]  %s1628_s0, 512, %s20_s21, [#allocation3], %s1047_s23, %s1047_s23, %s1048_s24  }
  0x18   :  { %s1049_s30 = smov [#allocation7]   ;;  %s1050_s7 = smov [#allocation8]  }
  0x19   :  { %s43_s6 = sshll.u32 %s1049_s30, 4  ;;  %s55_s8 = sshll.u32 %s1050_s7, 4  ;;  %s44_s6 = int_to_ptr.vmem [resolvable:$true] %s43_s6  ;;  %s56_s8 = int_to_ptr.vmem [resolvable:$true] %s55_s8 }
  0x1a   :  { %s985_s1 = scalar_lea.vmem %s44_s6, 512  ;;  %p990_p11 = scmp.lt.s32.totalorder %s44_s6, %s44_s6 }
  0x1b   :  { %p986_p10 = scmp.ne.s32.totalorder %s44_s6, %s985_s1  ;;  %p991_p12 = scmp.lt.s32.totalorder %s985_s1, %s985_s1 }
  0x1d   :  { %p992_p13 = por %p991_p12, %p990_p11 }
  0x1f   :  { %p993_p0 = pnand %p992_p13, %p986_p10 }
  0x21   :  { %996 = shalt.err (!%p993_p0)
}
  0x22   :  { %49 = dma.hbm_to_vmem [thread:$0]  %s1630_s2, 512, %s44_s6, [#allocation6], %s1047_s23, %s1047_s23, %s1048_s24  }
  0x23   :  { %s1005_s0 = scalar_lea.vmem %s56_s8, 512  ;;  %p1010_p2 = scmp.lt.s32.totalorder %s56_s8, %s56_s8 }
  0x24   :  { %p1006_p1 = scmp.ne.s32.totalorder %s56_s8, %s1005_s0  ;;  %p1011_p3 = scmp.lt.s32.totalorder %s1005_s0, %s1005_s0 }
  0x26   :  { %p1012_p4 = por %p1011_p3, %p1010_p2 }
  0x28   :  { %p1013_p5 = pnand %p1012_p4, %p1006_p1 }
  0x2a   :  { %1016 = shalt.err (!%p1013_p5)
}
  0x2b   :  { %61 = dma.hbm_to_vmem [thread:$0]  %s1631_s3, 512, %s56_s8, [#allocation9], %s1047_s23, %s1047_s23, %s1048_s24  }
  0x2c   :  { %1037 = dma.done.wait [#allocation3], 512  }
  0x2d   :  { %1038 = vsyncadd [#allocation3], 4294966784 }
  0x2e   :  { %1039 = dma.done.wait [#allocation6], 1024  }
  0x2f   :  { %1040 = vsyncadd [#allocation6], 4294966272 }
  0x30   :  { %1041 = dma.done.wait [#allocation9], 512  }
  0x31   :  { %1042 = vsyncadd [#allocation9], 4294966784  ;;  %v1051_v0 = vmov 0   ;;  %v88_v1 = vld [vmem:[%s1632_s4] sm:$0xff]  ;;  %v89_v2 = vld [vmem:[%s1632_s4 + $0x8] sm:$0xff]  ;;  %s1052_s3 = smov [#allocation10]  }
  0x32   :  { %824 = vset.pattern.permute.xlu0 %v1051_v0  ;;  %v1113_v3 = vld [vmem:[#allocation7] sm:$0xff]  ;;  %v1115_v4 = vld [vmem:[#allocation7 + $0x8] sm:$0xff]  ;;  %v1120_v6 = vld [vmem:[#allocation7 + $0x10] sm:$0xff]  ;;  %s781_s4 = sshll.u32 %s1052_s3, 4  ;;  %s782_s4 = int_to_ptr.vmem [resolvable:$true] %s781_s4 }
  0x33   :  { %96 = vperm.xlu0 %824, %v88_v1   ;;  %v1118_v5 = vadd.f32 1e-10, %v1113_v3  ;;  %v1123_v7 = vadd.f32 1e-10, %v1115_v4  ;;  %v1125_v8 = vld [vmem:[#allocation7 + $0x18] sm:$0xff]  ;;  %s1017_s16 = scalar_lea.vmem %s782_s4, 128  ;;  %p1022_p7 = scmp.lt.s32.totalorder %s782_s4, %s782_s4 }
  0x34   :  { %v1128_v9 = vadd.f32 1e-10, %v1120_v6  ;;  %v1131_v10 = vadd.f32 1e-10, %v1125_v8  ;;  %p1018_p6 = scmp.ne.s32.totalorder %s782_s4, %s1017_s16  ;;  %p1023_p8 = scmp.lt.s32.totalorder %s1017_s16, %s1017_s16 }
  0x35   :  { %v792_v11 = vadd.f32 -1.0, %v1118_v5  ;;  %v793_v12 = vadd.f32 -1.0, %v1123_v7  ;;  %825 = vlog2.f32 %v1118_v5 }
  0x36   :  { %v794_v13 = vadd.f32 -1.0, %v1128_v9  ;;  %v795_v14 = vadd.f32 -1.0, %v1131_v10  ;;  %827 = vlog2.f32 %v1123_v7  ;;  %p1024_p9 = por %p1023_p8, %p1022_p7 }
  0x37   :  { %101 = vperm.xlu0 %824, %v89_v2   ;;  %v1137_v15 = vmul.f32 0.00390625, %v792_v11  ;;  %v1139_v16 = vmul.f32 0.00390625, %v793_v12  ;;  %829 = vlog2.f32 %v1128_v9 }
  0x38   :  { %v1141_v17 = vmul.f32 0.00390625, %v794_v13  ;;  %v1144_v19 = vmul.f32 0.00390625, %v795_v14  ;;  %831 = vlog2.f32 %v1131_v10  ;;  %p1025_p10 = pnand %p1024_p9, %p1018_p6 }
  0x39   :  { %v132_v18 = vadd.f32 0.23616536, %v1137_v15  ;;  %v133_v20 = vadd.f32 0.23616536, %v1139_v16  ;;  %v196_v23 = vadd.f32 0.13671875, %v1137_v15  ;;  %v197_v26 = vadd.f32 0.13671875, %v1139_v16 }
  0x3a   :  { %v134_v21 = vadd.f32 0.23616536, %v1141_v17  ;;  %v135_v22 = vadd.f32 0.23616536, %v1144_v19  ;;  %v198_v27 = vadd.f32 0.13671875, %v1141_v17  ;;  %v199_v29 = vadd.f32 0.13671875, %v1144_v19 }
  0x3b   :  { %v136_v24 = vmul.f32 %v132_v18, %v1137_v15  ;;  %v137_v25 = vmul.f32 %v133_v20, %v1139_v16  ;;  %v200_v31 = vmul.f32 %v196_v23, %v1137_v15  ;;  %v201_v34 = vmul.f32 %v197_v26, %v1139_v16 }
  0x3c   :  { %v138_v28 = vmul.f32 %v134_v21, %v1141_v17  ;;  %v139_v30 = vmul.f32 %v135_v22, %v1144_v19  ;;  %v202_v35 = vmul.f32 %v198_v27, %v1141_v17  ;;  %v203_v37 = vmul.f32 %v199_v29, %v1144_v19 }
  0x3d   :  { %v140_v32 = vadd.f32 0.024399452, %v136_v24  ;;  %v141_v33 = vadd.f32 0.024399452, %v137_v25  ;;  %v204_v39 = vadd.f32 0.007797241, %v200_v31  ;;  %v205_v42 = vadd.f32 0.007797241, %v201_v34 }
  0x3e   :  { %v142_v36 = vadd.f32 0.024399452, %v138_v28  ;;  %v143_v38 = vadd.f32 0.024399452, %v139_v30  ;;  %v206_v43 = vadd.f32 0.007797241, %v202_v35  ;;  %v207_v45 = vadd.f32 0.007797241, %v203_v37 }
  0x3f   :  { %v144_v40 = vmul.f32 %v140_v32, %v1137_v15  ;;  %v145_v41 = vmul.f32 %v141_v33, %v1139_v16  ;;  %v208_v47 = vmul.f32 %v204_v39, %v1137_v15  ;;  %v209_v50 = vmul.f32 %v205_v42, %v1139_v16 }
  0x40   :  { %v146_v44 = vmul.f32 %v142_v36, %v1141_v17  ;;  %v147_v46 = vmul.f32 %v143_v38, %v1144_v19  ;;  %v210_v51 = vmul.f32 %v206_v43, %v1141_v17  ;;  %v211_v53 = vmul.f32 %v207_v45, %v1144_v19  ;;  %v77_v45 = vld [vmem:[#allocation2 + $0x8] sm:$0xff] }
  0x41   :  { %v148_v48 = vadd.f32 0.0014403766, %v144_v40  ;;  %v149_v49 = vadd.f32 0.0014403766, %v145_v41  ;;  %v212_v55 = vadd.f32 0.0002399087, %v208_v47  ;;  %v213_v58 = vadd.f32 0.0002399087, %v209_v50 }
  0x42   :  { %v150_v52 = vadd.f32 0.0014403766, %v146_v44  ;;  %v151_v54 = vadd.f32 0.0014403766, %v147_v46  ;;  %v214_v59 = vadd.f32 0.0002399087, %v210_v51  ;;  %v215_v61 = vadd.f32 0.0002399087, %v211_v53 }
  0x43   :  { %v152_v56 = vmul.f32 %v148_v48, %v1137_v15  ;;  %v153_v57 = vmul.f32 %v149_v49, %v1139_v16  ;;  %v216_v63 = vmul.f32 %v212_v55, %v1137_v15  ;;  %v217_v2 = vmul.f32 %v213_v58, %v1139_v16  ;;  %v76_v44 = vld [vmem:[#allocation2] sm:$0xff]  ;;  %v78_v47 = vld [vmem:[#allocation2 + $0x10] sm:$0xff]  ;;  %v79_v48 = vld [vmem:[#allocation2 + $0x18] sm:$0xff] }
  0x44   :  { %v154_v60 = vmul.f32 %v150_v52, %v1141_v17  ;;  %v155_v62 = vmul.f32 %v151_v54, %v1144_v19  ;;  %v218_v11 = vmul.f32 %v214_v59, %v1141_v17  ;;  %v219_v13 = vmul.f32 %v215_v61, %v1144_v19 }
  0x45   :  { %v156_v0 = vadd.f32 5.3140153e-05, %v152_v56  ;;  %v157_v1 = vadd.f32 5.3140153e-05, %v153_v57  ;;  %v220_v18 = vadd.f32 4.289672e-06, %v216_v63  ;;  %v221_v22 = vadd.f32 4.289672e-06, %v217_v2 }
  0x46   :  { %v158_v12 = vadd.f32 5.3140153e-05, %v154_v60  ;;  %v159_v14 = vadd.f32 5.3140153e-05, %v155_v62  ;;  %v222_v23 = vadd.f32 4.289672e-06, %v218_v11  ;;  %v223_v25 = vadd.f32 4.289672e-06, %v219_v13 }
  0x47   :  { %v160_v20 = vmul.f32 %v156_v0, %v1137_v15  ;;  %v161_v21 = vmul.f32 %v157_v1, %v1139_v16  ;;  %v224_v27 = vmul.f32 %v220_v18, %v1137_v15  ;;  %v225_v30 = vmul.f32 %v221_v22, %v1139_v16 }
  0x48   :  { %v162_v24 = vmul.f32 %v158_v12, %v1141_v17  ;;  %v163_v26 = vmul.f32 %v159_v14, %v1144_v19  ;;  %v226_v31 = vmul.f32 %v222_v23, %v1141_v17  ;;  %v227_v33 = vmul.f32 %v223_v25, %v1144_v19 }
  0x49   :  { %v164_v28 = vadd.f32 1.2546445e-06, %v160_v20  ;;  %v165_v29 = vadd.f32 1.2546445e-06, %v161_v21  ;;  %v228_v35 = vadd.f32 4.443791e-08, %v224_v27  ;;  %v1200_v57 = vadd.f32 %v1113_v3, %v76_v44 }
  0x4a   :  { %v166_v32 = vadd.f32 1.2546445e-06, %v162_v24  ;;  %v167_v34 = vadd.f32 1.2546445e-06, %v163_v26  ;;  %v229_v38 = vadd.f32 4.443791e-08, %v225_v30  ;;  %v1203_v58 = vadd.f32 %v1115_v4, %v77_v45 }
  0x4b   :  { %v168_v36 = vmul.f32 %v164_v28, %v1137_v15  ;;  %v169_v37 = vmul.f32 %v165_v29, %v1139_v16  ;;  %v230_v39 = vadd.f32 4.443791e-08, %v226_v31  ;;  %v231_v41 = vadd.f32 4.443791e-08, %v227_v33  ;;  %1638 = vst [vmem:[#allocation15_spill] sm:$0xff] %v1200_v57 }
  0x4c   :  { %v170_v40 = vmul.f32 %v166_v32, %v1141_v17  ;;  %v171_v42 = vmul.f32 %v167_v34, %v1144_v19  ;;  %v232_v43 = vmul.f32 %v228_v35, %v1137_v15  ;;  %v1190_v49 = vadd.f32 1.0, %v76_v44  ;;  %1639 = vst [vmem:[#allocation16_spill] sm:$0xff] %v1203_v58 }
  0x4d   :  { %v172_v46 = vadd.f32 1.8512726e-08, %v168_v36  ;;  %v173_v50 = vadd.f32 1.8512726e-08, %v169_v37  ;;  %v233_v51 = vmul.f32 %v229_v38, %v1139_v16  ;;  %v234_v52 = vmul.f32 %v230_v39, %v1141_v17 }
  0x4e   :  { %v1194_v53 = vadd.f32 1.0, %v77_v45  ;;  %v1196_v54 = vadd.f32 1.0, %v78_v47  ;;  %v174_v55 = vadd.f32 1.8512726e-08, %v170_v40  ;;  %v235_v56 = vmul.f32 %v231_v41, %v1144_v19 }
  0x4f   :  { %v175_v59 = vadd.f32 1.8512726e-08, %v171_v42  ;;  %v236_v60 = vadd.f32 2.4607516e-10, %v232_v43  ;;  %v1205_v61 = vadd.f32 1.0, %v79_v48  ;;  %v1208_v62 = vadd.f32 %v1120_v6, %v78_v47 }
  0x50   :  { %v1211_v63 = vadd.f32 %v1125_v8, %v79_v48  ;;  %v176_v0 = vmul.f32 %v172_v46, %v1137_v15  ;;  %v177_v1 = vmul.f32 %v173_v50, %v1139_v16  ;;  %v237_v2 = vadd.f32 2.4607516e-10, %v233_v51 }
  0x51   :  { %1640 = vst [vmem:[#allocation17_spill] sm:$0xff] %v1208_v62  ;;  %v238_v11 = vadd.f32 2.4607516e-10, %v234_v52  ;;  %v796_v12 = vadd.f32 -1.0, %v1190_v49  ;;  %v178_v13 = vmul.f32 %v174_v55, %v1141_v17  ;;  %v239_v14 = vadd.f32 2.4607516e-10, %v235_v56 }
  0x52   :  { %1641 = vst [vmem:[#allocation18_spill] sm:$0xff] %v1211_v63  ;;  %v797_v18 = vadd.f32 -1.0, %v1194_v53  ;;  %v1220_v20 = vadd.f32 1e-10, %v1200_v57  ;;  %v1223_v21 = vadd.f32 1e-10, %v1203_v58  ;;  %v179_v22 = vmul.f32 %v175_v59, %v1144_v19 }
  0x53   :  { %v240_v23 = vmul.f32 %v236_v60, %v1137_v15  ;;  %v1228_v24 = vadd.f32 1e-10, %v1208_v62  ;;  %v180_v25 = vadd.f32 1.560825e-10, %v176_v0  ;;  %v798_v26 = vadd.f32 -1.0, %v1196_v54 }
  0x54   :  { %v181_v27 = vadd.f32 1.560825e-10, %v177_v1  ;;  %v241_v28 = vmul.f32 %v237_v2, %v1139_v16  ;;  %v242_v29 = vmul.f32 %v238_v11, %v1141_v17  ;;  %v1234_v30 = vmul.f32 0.00390625, %v796_v12 }
  0x55   :  { %v182_v31 = vadd.f32 1.560825e-10, %v178_v13  ;;  %v243_v32 = vmul.f32 %v239_v14, %v1144_v19  ;;  %v799_v33 = vadd.f32 -1.0, %v1205_v61  ;;  %v1238_v34 = vmul.f32 0.00390625, %v797_v18  ;;  %v1275_v13 = vpop.eup %825 }
  0x56   :  { %v183_v35 = vadd.f32 1.560825e-10, %v179_v22  ;;  %v244_v36 = vadd.f32 5.595524e-13, %v240_v23  ;;  %v260_v37 = vadd.f32 0.23616536, %v1234_v30  ;;  %v184_v39 = vmul.f32 %v180_v25, %v1137_v15  ;;  %1642 = vst [vmem:[#allocation19_spill] sm:$0xff] %v1275_v13 }
  0x57   :  { %v1243_v38 = vadd.f32 1e-10, %v1211_v63  ;;  %v1246_v40 = vmul.f32 0.00390625, %v798_v26  ;;  %v185_v41 = vmul.f32 %v181_v27, %v1139_v16  ;;  %v245_v42 = vadd.f32 5.595524e-13, %v241_v28 }
  0x58   :  { %v246_v43 = vadd.f32 5.595524e-13, %v242_v29  ;;  %v261_v44 = vadd.f32 0.23616536, %v1238_v34  ;;  %v186_v45 = vmul.f32 %v182_v31, %v1141_v17  ;;  %v247_v46 = vadd.f32 5.595524e-13, %v243_v32  ;;  %v1285_v29 = vpop.eup %827 }
  0x59   :  { %v1252_v47 = vmul.f32 0.00390625, %v799_v33  ;;  %v262_v48 = vadd.f32 0.23616536, %v1246_v40  ;;  %v187_v50 = vmul.f32 %v183_v35, %v1144_v19  ;;  %v1257_v15 = vmul.f32 %v244_v36, %v1118_v5  ;;  %1643 = vst [vmem:[#allocation20_spill] sm:$0xff] %v1285_v29 }
  0x5a   :  { %v264_v51 = vmul.f32 %v260_v37, %v1234_v30  ;;  %v800_v16 = vadd.f32 -1.0, %v1220_v20  ;;  %v188_v52 = vadd.f32 5.756902e-13, %v184_v39  ;;  %v801_v56 = vadd.f32 -1.0, %v1223_v21 }
  0x5b   :  { %v263_v55 = vadd.f32 0.23616536, %v1252_v47  ;;  %v802_v17 = vadd.f32 -1.0, %v1228_v24  ;;  %v265_v59 = vmul.f32 %v261_v44, %v1238_v34  ;;  %v324_v60 = vadd.f32 0.13671875, %v1234_v30 }
  0x5c   :  { %v803_v19 = vadd.f32 -1.0, %v1243_v38  ;;  %v1267_v0 = vmul.f32 0.00390625, %v800_v16  ;;  %v266_v1 = vmul.f32 %v262_v48, %v1246_v40  ;;  %v325_v2 = vadd.f32 0.13671875, %v1238_v34 }
  0x5d   :  { %v1271_v11 = vmul.f32 0.00390625, %v801_v56  ;;  %v1273_v12 = vmul.f32 0.00390625, %v802_v17  ;;  %v268_v14 = vadd.f32 0.024399452, %v264_v51  ;;  %v326_v18 = vadd.f32 0.13671875, %v1246_v40 }
  0x5e   :  { %v1278_v22 = vmul.f32 0.00390625, %v803_v19  ;;  %v388_v23 = vadd.f32 0.23616536, %v1267_v0  ;;  %v267_v25 = vmul.f32 %v263_v55, %v1252_v47  ;;  %v327_v26 = vadd.f32 0.13671875, %v1252_v47  ;;  %v1298_v55 = vpop.eup %829 }
  0x5f   :  { %v389_v27 = vadd.f32 0.23616536, %v1271_v11  ;;  %v390_v28 = vadd.f32 0.23616536, %v1273_v12  ;;  %v1288_v31 = vmul.f32 %v245_v42, %v1123_v7  ;;  %v328_v32 = vmul.f32 %v324_v60, %v1234_v30  ;;  %1644 = vst [vmem:[#allocation21_spill] sm:$0xff] %v1298_v55  ;;  %v1302_v19 = vpop.eup %831 }
  0x60   :  { %v391_v33 = vadd.f32 0.23616536, %v1278_v22  ;;  %v392_v35 = vmul.f32 %v388_v23, %v1267_v0  ;;  %v269_v36 = vadd.f32 0.024399452, %v265_v59  ;;  %v270_v37 = vadd.f32 0.024399452, %v266_v1 }
  0x61   :  { %v393_v39 = vmul.f32 %v389_v27, %v1271_v11  ;;  %v394_v44 = vmul.f32 %v390_v28, %v1273_v12  ;;  %v329_v48 = vmul.f32 %v325_v2, %v1238_v34  ;;  %v330_v51 = vmul.f32 %v326_v18, %v1246_v40  ;;  %1645 = vst [vmem:[#allocation22_spill] sm:$0xff] %v1302_v19 }
  0x62   :  { %v395_v16 = vmul.f32 %v391_v33, %v1278_v22  ;;  %v396_v42 = vadd.f32 0.024399452, %v392_v35  ;;  %v271_v56 = vadd.f32 0.024399452, %v267_v25  ;;  %v272_v17 = vmul.f32 %v268_v14, %v1234_v30 }
  0x63   :  { %v331_v60 = vmul.f32 %v327_v26, %v1252_v47  ;;  %v397_v59 = vadd.f32 0.024399452, %v393_v39  ;;  %v1305_v1 = vmul.f32 %v246_v43, %v1128_v9  ;;  %v332_v23 = vadd.f32 0.007797241, %v328_v32 }
  0x64   :  { %v398_v2 = vadd.f32 0.024399452, %v394_v44  ;;  %v400_v18 = vmul.f32 %v396_v42, %v1267_v0  ;;  %v189_v27 = vadd.f32 5.756902e-13, %v185_v41  ;;  %v273_v28 = vmul.f32 %v269_v36, %v1238_v34 }
  0x65   :  { %v274_v33 = vmul.f32 %v270_v37, %v1246_v40  ;;  %v399_v25 = vadd.f32 0.024399452, %v395_v16  ;;  %v190_v35 = vadd.f32 5.756902e-13, %v186_v45  ;;  %v333_v14 = vadd.f32 0.007797241, %v329_v48 }
  0x66   :  { %v334_v63 = vadd.f32 0.007797241, %v330_v51  ;;  %v401_v26 = vmul.f32 %v397_v59, %v1271_v11  ;;  %v1312_v39 = vmul.f32 %v247_v46, %v1131_v10  ;;  %v275_v43 = vmul.f32 %v271_v56, %v1252_v47 }
  0x67   :  { %v276_v32 = vadd.f32 0.0014403766, %v272_v17  ;;  %v335_v44 = vadd.f32 0.007797241, %v331_v60  ;;  %v191_v62 = vadd.f32 5.756902e-13, %v187_v50  ;;  %v336_v41 = vmul.f32 %v332_v23, %v1234_v30 }
  0x68   :  { %v402_v36 = vmul.f32 %v398_v2, %v1273_v12  ;;  %v404_v42 = vadd.f32 0.0014403766, %v400_v18  ;;  %v1317_v37 = vmul.f32 256.0, %v188_v52  ;;  %v277_v45 = vadd.f32 0.0014403766, %v273_v28 }
  0x69   :  { %v278_v48 = vadd.f32 0.0014403766, %v274_v33  ;;  %v403_v51 = vmul.f32 %v399_v25, %v1278_v22  ;;  %v1320_v16 = vmul.f32 256.0, %v189_v27  ;;  %v337_v46 = vmul.f32 %v333_v14, %v1238_v34 }
  0x6a   :  { %v338_v56 = vmul.f32 %v334_v63, %v1246_v40  ;;  %v405_v17 = vadd.f32 0.0014403766, %v401_v26  ;;  %v1324_v60 = vmul.f32 256.0, %v190_v35  ;;  %v279_v50 = vadd.f32 0.0014403766, %v275_v43 }
  0x6b   :  { %v280_v59 = vmul.f32 %v276_v32, %v1234_v30  ;;  %v339_v23 = vmul.f32 %v335_v44, %v1252_v47  ;;  %v1328_v52 = vmul.f32 256.0, %v191_v62  ;;  %v340_v2 = vadd.f32 0.0002399087, %v336_v41 }
  0x6c   :  { %v406_v18 = vadd.f32 0.0014403766, %v402_v36  ;;  %v408_v28 = vmul.f32 %v404_v42, %v1267_v0  ;;  %v281_v27 = vmul.f32 %v277_v45, %v1238_v34  ;;  %v282_v33 = vmul.f32 %v278_v48, %v1246_v40 }
  0x6d   :  { %v407_v25 = vadd.f32 0.0014403766, %v403_v51  ;;  %v452_v63 = vadd.f32 0.13671875, %v1267_v0  ;;  %v341_v35 = vadd.f32 0.0002399087, %v337_v46  ;;  %v342_v14 = vadd.f32 0.0002399087, %v338_v56 }
  0x6e   :  { %v409_v26 = vmul.f32 %v405_v17, %v1271_v11  ;;  %v453_v43 = vadd.f32 0.13671875, %v1271_v11  ;;  %v283_v62 = vmul.f32 %v279_v50, %v1252_v47  ;;  %v284_v32 = vadd.f32 5.3140153e-05, %v280_v59 }
  0x6f   :  { %v343_v44 = vadd.f32 0.0002399087, %v339_v23  ;;  %v454_v41 = vadd.f32 0.13671875, %v1273_v12  ;;  %v344_v36 = vmul.f32 %v340_v2, %v1234_v30  ;;  %v410_v42 = vmul.f32 %v406_v18, %v1273_v12 }
  0x70   :  { %v412_v45 = vadd.f32 5.3140153e-05, %v408_v28  ;;  %v455_v48 = vadd.f32 0.13671875, %v1278_v22  ;;  %v285_v51 = vadd.f32 5.3140153e-05, %v281_v27  ;;  %v411_v56 = vmul.f32 %v407_v25, %v1278_v22 }
  0x71   :  { %v286_v46 = vadd.f32 5.3140153e-05, %v282_v33  ;;  %v456_v17 = vmul.f32 %v452_v63, %v1267_v0  ;;  %v345_v58 = vmul.f32 %v341_v35, %v1238_v34  ;;  %v346_v50 = vmul.f32 %v342_v14, %v1246_v40 }
  0x72   :  { %v413_v59 = vadd.f32 5.3140153e-05, %v409_v26  ;;  %v457_v23 = vmul.f32 %v453_v43, %v1271_v11  ;;  %v287_v57 = vadd.f32 5.3140153e-05, %v283_v62  ;;  %v288_v2 = vmul.f32 %v284_v32, %v1234_v30 }
  0x73   :  { %v347_v18 = vmul.f32 %v343_v44, %v1252_v47  ;;  %v458_v28 = vmul.f32 %v454_v41, %v1273_v12  ;;  %v348_v27 = vadd.f32 4.289672e-06, %v344_v36  ;;  %v414_v33 = vadd.f32 5.3140153e-05, %v410_v42 }
  0x74   :  { %v416_v25 = vmul.f32 %v412_v45, %v1267_v0  ;;  %v459_v63 = vmul.f32 %v455_v48, %v1278_v22  ;;  %v289_v35 = vmul.f32 %v285_v51, %v1238_v34  ;;  %v290_v14 = vmul.f32 %v286_v46, %v1246_v40 }
  0x75   :  { %v415_v26 = vadd.f32 5.3140153e-05, %v411_v56  ;;  %v460_v19 = vadd.f32 0.007797241, %v456_v17  ;;  %v349_v43 = vadd.f32 4.289672e-06, %v345_v58  ;;  %v350_v62 = vadd.f32 4.289672e-06, %v346_v50 }
  0x76   :  { %v417_v32 = vmul.f32 %v413_v59, %v1271_v11  ;;  %v461_v55 = vadd.f32 0.007797241, %v457_v23  ;;  %v291_v44 = vmul.f32 %v287_v57, %v1252_v47  ;;  %v292_v41 = vadd.f32 1.2546445e-06, %v288_v2 }
  0x77   :  { %v351_v36 = vadd.f32 4.289672e-06, %v347_v18  ;;  %v462_v42 = vadd.f32 0.007797241, %v458_v28  ;;  %v352_v45 = vmul.f32 %v348_v27, %v1234_v30  ;;  %v418_v48 = vmul.f32 %v414_v33, %v1273_v12 }
  0x78   :  { %v420_v29 = vadd.f32 1.2546445e-06, %v416_v25  ;;  %v463_v51 = vadd.f32 0.007797241, %v459_v63  ;;  %v293_v13 = vadd.f32 1.2546445e-06, %v289_v35  ;;  %v419_v56 = vmul.f32 %v415_v26, %v1278_v22 }
  0x79   :  { %v294_v46 = vadd.f32 1.2546445e-06, %v290_v14  ;;  %v464_v58 = vmul.f32 %v460_v19, %v1267_v0  ;;  %v353_v17 = vmul.f32 %v349_v43, %v1238_v34  ;;  %v354_v50 = vmul.f32 %v350_v62, %v1246_v40 }
  0x7a   :  { %v421_v57 = vadd.f32 1.2546445e-06, %v417_v32  ;;  %v465_v59 = vmul.f32 %v461_v55, %v1271_v11  ;;  %v295_v23 = vadd.f32 1.2546445e-06, %v291_v44  ;;  %v296_v2 = vmul.f32 %v292_v41, %v1234_v30 }
  0x7b   :  { %v355_v18 = vmul.f32 %v351_v36, %v1252_v47  ;;  %v466_v28 = vmul.f32 %v462_v42, %v1273_v12  ;;  %v356_v27 = vadd.f32 4.443791e-08, %v352_v45  ;;  %v422_v33 = vadd.f32 1.2546445e-06, %v418_v48 }
  0x7c   :  { %v424_v25 = vmul.f32 %v420_v29, %v1267_v0  ;;  %v467_v19 = vmul.f32 %v463_v51, %v1278_v22  ;;  %v297_v63 = vmul.f32 %v293_v13, %v1238_v34  ;;  %v298_v35 = vmul.f32 %v294_v46, %v1246_v40 }
  0x7d   :  { %v423_v14 = vadd.f32 1.2546445e-06, %v419_v56  ;;  %v468_v26 = vadd.f32 0.0002399087, %v464_v58  ;;  %v357_v55 = vadd.f32 4.443791e-08, %v353_v17  ;;  %v425_v62 = vmul.f32 %v421_v57, %v1271_v11 }
  0x7e   :  { %v358_v43 = vadd.f32 4.443791e-08, %v354_v50  ;;  %v469_v32 = vadd.f32 0.0002399087, %v465_v59  ;;  %v299_v44 = vmul.f32 %v295_v23, %v1252_v47  ;;  %v300_v41 = vadd.f32 1.8512726e-08, %v296_v2 }
  0x7f   :  { %v359_v36 = vadd.f32 4.443791e-08, %v355_v18  ;;  %v470_v42 = vadd.f32 0.0002399087, %v466_v28  ;;  %v360_v29 = vmul.f32 %v356_v27, %v1234_v30  ;;  %v426_v45 = vmul.f32 %v422_v33, %v1273_v12 }
  0x80   :  { %v428_v48 = vadd.f32 1.8512726e-08, %v424_v25  ;;  %v471_v13 = vadd.f32 0.0002399087, %v467_v19  ;;  %v301_v51 = vadd.f32 1.8512726e-08, %v297_v63  ;;  %v427_v56 = vmul.f32 %v423_v14, %v1278_v22 }
  0x81   :  { %v302_v46 = vadd.f32 1.8512726e-08, %v298_v35  ;;  %v472_v58 = vmul.f32 %v468_v26, %v1267_v0  ;;  %v361_v17 = vmul.f32 %v357_v55, %v1238_v34  ;;  %v362_v50 = vmul.f32 %v358_v43, %v1246_v40 }
  0x82   :  { %v429_v57 = vadd.f32 1.8512726e-08, %v425_v62  ;;  %v473_v59 = vmul.f32 %v469_v32, %v1271_v11  ;;  %v303_v23 = vadd.f32 1.8512726e-08, %v299_v44  ;;  %v304_v2 = vmul.f32 %v300_v41, %v1234_v30 }
  0x83   :  { %v363_v18 = vmul.f32 %v359_v36, %v1252_v47  ;;  %v474_v28 = vmul.f32 %v470_v42, %v1273_v12  ;;  %v364_v27 = vadd.f32 2.4607516e-10, %v360_v29  ;;  %v430_v33 = vadd.f32 1.8512726e-08, %v426_v45 }
  0x84   :  { %v432_v25 = vmul.f32 %v428_v48, %v1267_v0  ;;  %v475_v19 = vmul.f32 %v471_v13, %v1278_v22  ;;  %v305_v63 = vmul.f32 %v301_v51, %v1238_v34  ;;  %v306_v35 = vmul.f32 %v302_v46, %v1246_v40 }
  0x85   :  { %v431_v14 = vadd.f32 1.8512726e-08, %v427_v56  ;;  %v476_v26 = vadd.f32 4.289672e-06, %v472_v58  ;;  %v365_v55 = vadd.f32 2.4607516e-10, %v361_v17  ;;  %v433_v62 = vmul.f32 %v429_v57, %v1271_v11 }
  0x86   :  { %v366_v43 = vadd.f32 2.4607516e-10, %v362_v50  ;;  %v477_v32 = vadd.f32 4.289672e-06, %v473_v59  ;;  %v307_v44 = vmul.f32 %v303_v23, %v1252_v47  ;;  %v308_v41 = vadd.f32 1.560825e-10, %v304_v2 }
  0x87   :  { %v367_v36 = vadd.f32 2.4607516e-10, %v363_v18  ;;  %v478_v42 = vadd.f32 4.289672e-06, %v474_v28  ;;  %v368_v29 = vmul.f32 %v364_v27, %v1234_v30  ;;  %v434_v45 = vmul.f32 %v430_v33, %v1273_v12 }
  0x88   :  { %v436_v48 = vadd.f32 1.560825e-10, %v432_v25  ;;  %v479_v13 = vadd.f32 4.289672e-06, %v475_v19  ;;  %v309_v51 = vadd.f32 1.560825e-10, %v305_v63  ;;  %v435_v56 = vmul.f32 %v431_v14, %v1278_v22 }
  0x89   :  { %v310_v46 = vadd.f32 1.560825e-10, %v306_v35  ;;  %v480_v58 = vmul.f32 %v476_v26, %v1267_v0  ;;  %v369_v17 = vmul.f32 %v365_v55, %v1238_v34  ;;  %v370_v50 = vmul.f32 %v366_v43, %v1246_v40 }
  0x8a   :  { %v437_v57 = vadd.f32 1.560825e-10, %v433_v62  ;;  %v481_v59 = vmul.f32 %v477_v32, %v1271_v11  ;;  %v311_v23 = vadd.f32 1.560825e-10, %v307_v44  ;;  %v312_v2 = vmul.f32 %v308_v41, %v1234_v30 }
  0x8b   :  { %v371_v18 = vmul.f32 %v367_v36, %v1252_v47  ;;  %v482_v28 = vmul.f32 %v478_v42, %v1273_v12  ;;  %v372_v27 = vadd.f32 5.595524e-13, %v368_v29  ;;  %v438_v33 = vadd.f32 1.560825e-10, %v434_v45 }
  0x8c   :  { %v440_v25 = vmul.f32 %v436_v48, %v1267_v0  ;;  %v483_v19 = vmul.f32 %v479_v13, %v1278_v22  ;;  %v313_v63 = vmul.f32 %v309_v51, %v1238_v34  ;;  %v314_v35 = vmul.f32 %v310_v46, %v1246_v40 }
  0x8d   :  { %v439_v14 = vadd.f32 1.560825e-10, %v435_v56  ;;  %v484_v26 = vadd.f32 4.443791e-08, %v480_v58  ;;  %v373_v55 = vadd.f32 5.595524e-13, %v369_v17  ;;  %v374_v43 = vadd.f32 5.595524e-13, %v370_v50 }
  0x8e   :  { %v441_v30 = vmul.f32 %v437_v57, %v1271_v11  ;;  %v485_v62 = vadd.f32 4.443791e-08, %v481_v59  ;;  %v315_v32 = vmul.f32 %v311_v23, %v1252_v47  ;;  %v316_v44 = vadd.f32 5.756902e-13, %v312_v2 }
  0x8f   :  { %v375_v41 = vadd.f32 5.595524e-13, %v371_v18  ;;  %v486_v36 = vadd.f32 4.443791e-08, %v482_v28  ;;  %v376_v42 = vmul.f32 %v372_v27, %v1190_v49  ;;  %v442_v29 = vmul.f32 %v438_v33, %v1273_v12 }
  0x90   :  { %v444_v45 = vadd.f32 5.756902e-13, %v440_v25  ;;  %v487_v34 = vadd.f32 4.443791e-08, %v483_v19  ;;  %v317_v48 = vadd.f32 5.756902e-13, %v313_v63  ;;  %v443_v40 = vmul.f32 %v439_v14, %v1278_v22 }
  0x91   :  { %v488_v13 = vmul.f32 %v484_v26, %v1267_v0  ;;  %833 = vrcp.f32 %v1257_v15  ;;  %v377_v46 = vmul.f32 %v373_v55, %v1194_v53  ;;  %v445_v47 = vadd.f32 5.756902e-13, %v441_v30  ;;  %v90_v15 = vld [vmem:[#allocation5] sm:$0xff]  ;;  %v91_v25 = vld [vmem:[#allocation5 + $0x8] sm:$0xff]  ;;  %v92_v14 = vld [vmem:[#allocation5 + $0x10] sm:$0xff] }
  0x92   :  { %v489_v56 = vmul.f32 %v485_v62, %v1271_v11  ;;  %835 = vrcp.f32 %v1288_v31  ;;  %v318_v58 = vadd.f32 5.756902e-13, %v314_v35  ;;  %v378_v17 = vmul.f32 %v374_v43, %v1196_v54  ;;  %v93_v26 = vld [vmem:[#allocation5 + $0x18] sm:$0xff] }
  0x93   :  { %v490_v50 = vmul.f32 %v486_v36, %v1273_v12  ;;  %837 = vrcp.f32 %v1305_v1  ;;  %v446_v57 = vadd.f32 5.756902e-13, %v442_v29  ;;  %v448_v59 = vmul.f32 256.0, %v444_v45 }
  0x94   :  { %v491_v23 = vmul.f32 %v487_v34, %v1278_v22  ;;  %839 = vrcp.f32 %v376_v42  ;;  %v379_v2 = vmul.f32 %v375_v41, %v1205_v61  ;;  %v447_v18 = vadd.f32 5.756902e-13, %v443_v40 }
  0x95   :  { %v492_v28 = vadd.f32 2.4607516e-10, %v488_v13  ;;  %841 = vrcp.f32 %v1312_v39  ;;  %v319_v31 = vadd.f32 5.756902e-13, %v315_v32  ;;  %v449_v27 = vmul.f32 256.0, %v445_v47 }
  0x96   :  { %v493_v33 = vadd.f32 2.4607516e-10, %v489_v56  ;;  %843 = vrcp.f32 %v377_v46  ;;  %v1417_v19 = vmul.f32 256.0, %v316_v44  ;;  %v1419_v1 = vmul.f32 256.0, %v317_v48 }
  0x97   :  { %v494_v63 = vadd.f32 2.4607516e-10, %v490_v50  ;;  %845 = vrcp.f32 %v378_v17  ;;  %v450_v43 = vmul.f32 256.0, %v446_v57  ;;  %v495_v30 = vadd.f32 2.4607516e-10, %v491_v23 }
  0x98   :  { %847 = vrcp.f32 %v448_v59  ;;  %v1423_v39 = vmul.f32 256.0, %v318_v58  ;;  %v451_v62 = vmul.f32 256.0, %v447_v18  ;;  %v496_v32 = vmul.f32 %v492_v28, %v1267_v0 }
  0x99   :  { %849 = vrcp.f32 %v379_v2  ;;  %v497_v41 = vmul.f32 %v493_v33, %v1271_v11  ;;  %v544_v36 = vadd.f32 6.5, %v1118_v5  ;;  %v498_v45 = vmul.f32 %v494_v63, %v1273_v12 }
  0x9a   :  { %851 = vrcp.f32 %v449_v27  ;;  %v545_v34 = vadd.f32 6.5, %v1123_v7  ;;  %v499_v48 = vmul.f32 %v495_v30, %v1278_v22  ;;  %v546_v0 = vadd.f32 6.5, %v1128_v9 }
  0x9b   :  { %853 = vrcp.f32 %v450_v43  ;;  %v323_v11 = vmul.f32 256.0, %v319_v31  ;;  %v1441_v13 = vadd.f32 -0.5, %v1118_v5  ;;  %v500_v47 = vadd.f32 5.595524e-13, %v496_v32 }
  0x9c   :  { %855 = vrcp.f32 %v451_v62  ;;  %v501_v12 = vadd.f32 5.595524e-13, %v497_v41  ;;  %v502_v58 = vadd.f32 5.595524e-13, %v498_v45  ;;  %v503_v50 = vadd.f32 5.595524e-13, %v499_v48 }
  0x9d   :  { %857 = vlog2.f32 %v544_v36  ;;  %v504_v28 = vmul.f32 %v500_v47, %v1220_v20  ;;  %v1462_v43 = vadd.f32 -0.5, %v1123_v7  ;;  %v1465_v30 = vadd.f32 -0.5, %v1128_v9 }
  0x9e   :  { %v834_v46 = vpop.eup %833  ;;  %859 = vlog2.f32 %v545_v34  ;;  %v505_v27 = vmul.f32 %v501_v12, %v1223_v21  ;;  %v506_v33 = vmul.f32 %v502_v58, %v1228_v24  ;;  %v507_v63 = vmul.f32 %v503_v50, %v1243_v38 }
  0x9f   :  { %v836_v56 = vpop.eup %835  ;;  %861 = vlog2.f32 %v546_v0  ;;  %v1469_v41 = vadd.f32 -0.5, %v1131_v10  ;;  %v1473_v45 = vadd.f32 -0.5, %v1190_v49  ;;  %v592_v7 = vadd.f32 6.5, %v1220_v20 }
  0xa0   :  { %v838_v5 = vpop.eup %837  ;;  %v511_v31 = vmul.f32 %v836_v56, %v1320_v16  ;;  %v593_v9 = vadd.f32 6.5, %v1223_v21  ;;  %v595_v12 = vadd.f32 6.5, %v1243_v38  ;;  %v1488_v56 = vadd.f32 -0.5, %v1205_v61 }
  0xa1   :  { %v840_v23 = vpop.eup %839 }
  0xa2   :  { %v842_v18 = vpop.eup %841 }
  0xae   :  { %v97_v51 = vpop.permute.xlu0 %96 }
  0xaf   :  { %v1421_v55 = vmul.f32 %v97_v51, %v90_v15  ;;  %v1426_v44 = vmul.f32 %v97_v51, %v91_v25  ;;  %v547_v51 = vadd.f32 6.5, %v1131_v10  ;;  %v509_v15 = vmul.f32 %v834_v46, %v1317_v37 }
  0xb0   :  { %v569_v25 = vadd.f32 6.5, %v1194_v53  ;;  %v515_v10 = vmul.f32 %v842_v18, %v1328_v52  ;;  %v1491_v52 = vadd.f32 -0.5, %v1220_v20  ;;  %v1646_v20 = vld [vmem:[#allocation19_spill] sm:$0xff] }
  0xb1   :  { %v644_v40 = vadd.f32 %v1421_v55, %v1113_v3  ;;  %v645_v22 = vadd.f32 %v1426_v44, %v1115_v4  ;;  %863 = vlog2.f32 %v547_v51 }
  0xb2   :  { %v102_v35 = vpop.permute.xlu0 %101 }
  0xb3   :  { %v1430_v42 = vmul.f32 %v102_v35, %v92_v14  ;;  %v1432_v29 = vmul.f32 %v102_v35, %v93_v26  ;;  %v648_v57 = vadd.f32 1e-10, %v644_v40  ;;  %v649_v59 = vadd.f32 1e-10, %v645_v22 }
  0xb4   :  { %v517_v35 = vmul.f32 %v840_v23, %v1417_v19  ;;  %v570_v14 = vadd.f32 6.5, %v1196_v54  ;;  %v513_v26 = vmul.f32 %v838_v5, %v1324_v60  ;;  %v571_v19 = vadd.f32 6.5, %v1205_v61 }
  0xb5   :  { %v646_v3 = vadd.f32 %v1430_v42, %v1120_v6  ;;  %v647_v17 = vadd.f32 %v1432_v29, %v1125_v8  ;;  %v568_v6 = vadd.f32 6.5, %v1190_v49  ;;  %865 = vlog2.f32 %v648_v57  ;;  %v844_v8 = vpop.eup %843 }
  0xb6   :  { %867 = vlog2.f32 %v649_v59  ;;  %v846_v37 = vpop.eup %845  ;;  %v519_v32 = vmul.f32 %v844_v8, %v1419_v1  ;;  %v524_v34 = vmul.f32 %v517_v35, %v509_v15  ;;  %v1480_v40 = vadd.f32 -0.5, %v1194_v53  ;;  %v1649_v8 = vld [vmem:[#allocation22_spill] sm:$0xff] }
  0xb7   :  { %v650_v2 = vadd.f32 1e-10, %v646_v3  ;;  %v651_v4 = vadd.f32 1e-10, %v647_v17  ;;  %v848_v16 = vpop.eup %847  ;;  %v521_v60 = vmul.f32 %v846_v37, %v1423_v39  ;;  %v594_v49 = vadd.f32 6.5, %v1228_v24 }
  0xb8   :  { %v850_v62 = vpop.eup %849  ;;  %v529_v48 = vmul.f32 %v848_v16, %v504_v28  ;;  %v525_v46 = vmul.f32 %v519_v32, %v511_v31  ;;  %v1485_v39 = vadd.f32 -0.5, %v1196_v54  ;;  %v1494_v57 = vadd.f32 -0.5, %v1223_v21  ;;  %v1648_v28 = vld [vmem:[#allocation21_spill] sm:$0xff] }
  0xb9   :  { %869 = vlog2.f32 %v650_v2  ;;  %v852_v36 = vpop.eup %851  ;;  %v523_v0 = vmul.f32 %v850_v62, %v323_v11  ;;  %v526_v11 = vmul.f32 %v521_v60, %v513_v26  ;;  %v1497_v61 = vadd.f32 -0.5, %v1228_v24 }
  0xba   :  { %871 = vlog2.f32 %v651_v4  ;;  %v854_v1 = vpop.eup %853  ;;  %v531_v47 = vmul.f32 %v852_v36, %v505_v27  ;;  %v536_v3 = vmul.f32 %v529_v48, %v524_v34  ;;  %v1500_v23 = vmul.f32 0.6931472, %v1646_v20  ;;  %v1647_v4 = vld [vmem:[#allocation20_spill] sm:$0xff] }
  0xbb   :  { %873 = vlog2.f32 %v568_v6  ;;  %v856_v51 = vpop.eup %855  ;;  %v533_v58 = vmul.f32 %v854_v1, %v506_v33  ;;  %v527_v5 = vmul.f32 %v523_v0, %v515_v10  ;;  %v1503_v18 = vmul.f32 0.6931472, %v1647_v4  ;;  %v1533_v0 = vld [vmem:[#allocation8] sm:$0xff] }
  0xbc   :  { %875 = vlog2.f32 %v569_v25  ;;  %v858_v22 = vpop.eup %857  ;;  %v535_v50 = vmul.f32 %v856_v51, %v507_v63  ;;  %v537_v59 = vmul.f32 %v531_v47, %v525_v46  ;;  %v1506_v31 = vmul.f32 0.6931472, %v1648_v28  ;;  %v929_v46 = vld [vmem:[#allocation7] sm:$0xff] }
  0xbd   :  { %877 = vlog2.f32 %v570_v14  ;;  %v860_v53 = vpop.eup %859  ;;  %v549_v2 = vmul.f32 0.6931472, %v858_v22  ;;  %v538_v6 = vmul.f32 %v533_v58, %v526_v11  ;;  %v1509_v27 = vmul.f32 0.6931472, %v1649_v8  ;;  %v930_v22 = vld [vmem:[#allocation7 + $0x8] sm:$0xff] }
  0xbe   :  { %879 = vlog2.f32 %v571_v19  ;;  %v862_v17 = vpop.eup %861  ;;  %v539_v25 = vmul.f32 %v535_v50, %v527_v5  ;;  %v551_v37 = vmul.f32 0.6931472, %v860_v53  ;;  %v632_v63 = vadd.f32 1e-10, %v1421_v55 }
  0xbf   :  { %881 = vlog2.f32 %v592_v7  ;;  %v864_v54 = vpop.eup %863  ;;  %v553_v16 = vmul.f32 0.6931472, %v862_v17  ;;  %v556_v19 = vmul.f32 %v1441_v13, %v549_v2  ;;  %v633_v36 = vadd.f32 1e-10, %v1426_v44 }
  0xc0   :  { %883 = vlog2.f32 %v593_v9  ;;  %v555_v60 = vmul.f32 0.6931472, %v864_v54  ;;  %v634_v34 = vadd.f32 1e-10, %v1430_v42  ;;  %v557_v10 = vmul.f32 %v1462_v43, %v551_v37  ;;  %v931_v43 = vld [vmem:[#allocation7 + $0x10] sm:$0xff]  ;;  %v1542_v37 = vld [vmem:[#allocation8 + $0x18] sm:$0xff] }
  0xc1   :  { %885 = vlog2.f32 %v594_v49  ;;  %v635_v13 = vadd.f32 1e-10, %v1432_v29  ;;  %v558_v49 = vmul.f32 %v1465_v30, %v553_v16  ;;  %v692_v30 = vsub.f32 1.0, %v1533_v0 }
  0xc2   :  { %887 = vlog2.f32 %v595_v12  ;;  %v866_v15 = vpop.eup %865 }
  0xc3   :  { %v868_v21 = vpop.eup %867  ;;  %889 = vlog2.f32 %v536_v3  ;;  %v1511_v24 = vmul.f32 0.6931472, %v866_v15  ;;  %v932_v3 = vld [vmem:[#allocation7 + $0x18] sm:$0xff]  ;;  %v559_v15 = vmul.f32 %v1469_v41, %v555_v60  ;;  %v562_v8 = vadd.f32 -6.5810614, %v558_v49 }
  0xc4   :  { %v1514_v35 = vmul.f32 0.6931472, %v868_v21  ;;  %891 = vlog2.f32 %v537_v59  ;;  %v560_v21 = vadd.f32 -6.5810614, %v556_v19 }
  0xc5   :  { %v712_v62 = vsub.f32 %v1500_v23, %v1511_v24  ;;  %893 = vlog2.f32 %v538_v6  ;;  %v561_v6 = vadd.f32 -6.5810614, %v557_v10  ;;  %v696_v10 = vadd.f32 1e-10, %v692_v30 }
  0xc6   :  { %v870_v33 = vpop.eup %869  ;;  %v713_v55 = vsub.f32 %v1503_v18, %v1514_v35  ;;  %895 = vlog2.f32 %v539_v25  ;;  %v1540_v25 = vld [vmem:[#allocation8 + $0x10] sm:$0xff] }
  0xc7   :  { %v872_v14 = vpop.eup %871  ;;  %v1516_v26 = vmul.f32 0.6931472, %v870_v33  ;;  %897 = vlog2.f32 %v632_v63  ;;  %v716_v42 = vmul.f32 %v929_v46, %v712_v62  ;;  %v1538_v33 = vld [vmem:[#allocation8 + $0x8] sm:$0xff] }
  0xc8   :  { %v874_v32 = vpop.eup %873  ;;  %v1522_v7 = vmul.f32 0.6931472, %v872_v14  ;;  %899 = vlog2.f32 %v633_v36  ;;  %v717_v53 = vmul.f32 %v930_v22, %v713_v55  ;;  %v563_v36 = vadd.f32 -6.5810614, %v559_v15 }
  0xc9   :  { %v876_v9 = vpop.eup %875  ;;  %v714_v48 = vsub.f32 %v1506_v31, %v1516_v26  ;;  %v573_v51 = vmul.f32 0.6931472, %v874_v32  ;;  %901 = vlog2.f32 %v634_v34  ;;  %v720_v5 = vmul.f32 1.442695, %v716_v42 }
  0xca   :  { %v878_v1 = vpop.eup %877  ;;  %v715_v44 = vsub.f32 %v1509_v27, %v1522_v7  ;;  %v575_v12 = vmul.f32 0.6931472, %v876_v9  ;;  %903 = vlog2.f32 %v635_v13  ;;  %v722_v54 = vmul.f32 1.442695, %v717_v53 }
  0xcb   :  { %v880_v47 = vpop.eup %879  ;;  %v718_v11 = vmul.f32 %v931_v43, %v714_v48  ;;  %v577_v29 = vmul.f32 0.6931472, %v878_v1  ;;  %905 = vpow2.f32 %v720_v5  ;;  %v580_v63 = vmul.f32 %v1473_v45, %v573_v51 }
  0xcc   :  { %v882_v58 = vpop.eup %881  ;;  %v719_v17 = vmul.f32 %v932_v3, %v715_v44  ;;  %v579_v2 = vmul.f32 0.6931472, %v880_v47  ;;  %907 = vpow2.f32 %v722_v54  ;;  %v581_v14 = vmul.f32 %v1480_v40, %v575_v12 }
  0xcd   :  { %v884_v50 = vpop.eup %883  ;;  %v724_v59 = vmul.f32 1.442695, %v718_v11  ;;  %v582_v41 = vmul.f32 %v1485_v39, %v577_v29  ;;  %v597_v62 = vmul.f32 0.6931472, %v882_v58  ;;  %v815_v9 = vadd.f32 -0.5, %v1243_v38 }
  0xce   :  { %v886_v20 = vpop.eup %885  ;;  %v726_v4 = vmul.f32 1.442695, %v719_v17  ;;  %v599_v32 = vmul.f32 0.6931472, %v884_v50  ;;  %v583_v55 = vmul.f32 %v1488_v56, %v579_v2  ;;  %v693_v48 = vsub.f32 1.0, %v1538_v33 }
  0xcf   :  { %v888_v28 = vpop.eup %887  ;;  %909 = vpow2.f32 %v724_v59  ;;  %v601_v19 = vmul.f32 0.6931472, %v886_v20  ;;  %v694_v45 = vsub.f32 1.0, %v1540_v25  ;;  %v1551_v40 = vadd.f32 %v580_v63, %v560_v21 }
  0xd0   :  { %v890_v16 = vpop.eup %889  ;;  %911 = vpow2.f32 %v726_v4  ;;  %v603_v60 = vmul.f32 0.6931472, %v888_v28  ;;  %v1553_v39 = vadd.f32 %v581_v14, %v561_v6  ;;  %v695_v1 = vsub.f32 1.0, %v1542_v37 }
  0xd1   :  { %v892_v34 = vpop.eup %891  ;;  %v1558_v44 = vadd.f32 %v582_v41, %v562_v8  ;;  %v1561_v38 = vmul.f32 %v1491_v52, %v597_v62  ;;  %v1564_v56 = vmul.f32 %v1494_v57, %v599_v32  ;;  %v1567_v49 = vmul.f32 %v1497_v61, %v601_v19 }
  0xd2   :  { %v894_v13 = vpop.eup %893  ;;  %v1569_v46 = vadd.f32 %v583_v55, %v563_v36  ;;  %v1571_v42 = vmul.f32 %v815_v9, %v603_v60  ;;  %v697_v12 = vadd.f32 1e-10, %v693_v48  ;;  %v698_v53 = vadd.f32 1e-10, %v694_v45 }
  0xd3   :  { %v896_v51 = vpop.eup %895  ;;  %v699_v43 = vadd.f32 1e-10, %v695_v1  ;;  %v608_v52 = vsub.f32 %v1551_v40, %v1561_v38  ;;  %v609_v57 = vsub.f32 %v1553_v39, %v1564_v56  ;;  %v610_v61 = vsub.f32 %v1558_v44, %v1567_v49  ;;  %v1606_v44 = vld [vmem:[#allocation2 + $0x8] sm:$0xff]  ;;  %v935_v49 = vld [vmem:[#allocation2 + $0x10] sm:$0xff] }
  0xd4   :  { %v898_v47 = vpop.eup %897  ;;  %913 = vlog2.f32 %v696_v10  ;;  %v611_v29 = vsub.f32 %v1569_v46, %v1571_v42  ;;  %v613_v3 = vmul.f32 0.6931472, %v890_v16  ;;  %v615_v17 = vmul.f32 0.6931472, %v892_v34  ;;  %v1651_v34 = vld [vmem:[#allocation16_spill] sm:$0xff] }
  0xd5   :  { %v900_v22 = vpop.eup %899  ;;  %v637_v5 = vmul.f32 0.6931472, %v898_v47  ;;  %v617_v54 = vmul.f32 0.6931472, %v894_v13  ;;  %v619_v59 = vmul.f32 0.6931472, %v896_v51  ;;  %915 = vlog2.f32 %v697_v12 }
  0xd6   :  { %v902_v11 = vpop.eup %901  ;;  %v639_v20 = vmul.f32 0.6931472, %v900_v22  ;;  %v660_v4 = vsub.f32 %v1511_v24, %v1500_v23  ;;  %917 = vlog2.f32 %v698_v53  ;;  %v661_v8 = vsub.f32 %v1514_v35, %v1503_v18  ;;  %v1650_v35 = vld [vmem:[#allocation15_spill] sm:$0xff]  ;;  %v1653_v13 = vld [vmem:[#allocation18_spill] sm:$0xff]  ;;  %v936_v47 = vld [vmem:[#allocation2 + $0x18] sm:$0xff] }
  0xd7   :  { %v904_v58 = vpop.eup %903  ;;  %v641_v2 = vmul.f32 0.6931472, %v902_v11  ;;  %919 = vlog2.f32 %v699_v43  ;;  %v662_v41 = vsub.f32 %v1516_v26, %v1506_v31  ;;  %v668_v16 = vsub.f32 %v1500_v23, %v637_v5 }
  0xd8   :  { %v906_v50 = vpop.eup %905  ;;  %v643_v6 = vmul.f32 0.6931472, %v904_v58  ;;  %v663_v32 = vsub.f32 %v1522_v7, %v1509_v27  ;;  %v664_v55 = vmul.f32 %v660_v4, %v1650_v35  ;;  %v665_v23 = vmul.f32 %v661_v8, %v1651_v34  ;;  %v1652_v7 = vld [vmem:[#allocation17_spill] sm:$0xff] }
  0xd9   :  { %v908_v15 = vpop.eup %907  ;;  %v728_v28 = vmul.f32 %v906_v50, %v692_v30  ;;  %v669_v30 = vsub.f32 %v1503_v18, %v639_v20  ;;  %v670_v9 = vsub.f32 %v1506_v31, %v641_v2  ;;  %v666_v39 = vmul.f32 %v662_v41, %v1652_v7  ;;  %v1602_v18 = vld [vmem:[#allocation2] sm:$0xff] }
  0xda   :  { %v729_v63 = vmul.f32 %v908_v15, %v693_v48  ;;  %v671_v48 = vsub.f32 %v1509_v27, %v643_v6  ;;  %v667_v31 = vmul.f32 %v663_v32, %v1653_v13  ;;  %v620_v27 = vadd.f32 %v613_v3, %v608_v52 }
  0xdb   :  { %v732_v24 = vadd.f32 %v728_v28, %v1533_v0  ;;  %v673_v38 = vmul.f32 %v1606_v44, %v669_v30  ;;  %v674_v51 = vmul.f32 %v935_v49, %v670_v9  ;;  %v621_v42 = vadd.f32 %v615_v17, %v609_v57 }
  0xdc   :  { %v910_v21 = vpop.eup %909  ;;  %v733_v36 = vadd.f32 %v729_v63, %v1538_v33  ;;  %v675_v12 = vmul.f32 %v936_v47, %v671_v48  ;;  %v622_v43 = vadd.f32 %v617_v54, %v610_v61  ;;  %v623_v58 = vadd.f32 %v619_v59, %v611_v29 }
  0xdd   :  { %v912_v14 = vpop.eup %911  ;;  %v730_v62 = vmul.f32 %v910_v21, %v694_v45  ;;  %v736_v26 = vadd.f32 1e-10, %v732_v24  ;;  %v677_v22 = vadd.f32 %v673_v38, %v665_v23  ;;  %v678_v11 = vadd.f32 %v674_v51, %v666_v39 }
  0xde   :  { %v731_v19 = vmul.f32 %v912_v14, %v695_v1  ;;  %v737_v40 = vadd.f32 1e-10, %v733_v36  ;;  %v672_v1 = vmul.f32 %v1602_v18, %v668_v16  ;;  %v679_v5 = vadd.f32 %v675_v12, %v667_v31 }
  0xdf   :  { %v734_v60 = vadd.f32 %v730_v62, %v1540_v25  ;;  %921 = vlog2.f32 %v736_v26  ;;  %v681_v2 = vadd.f32 %v677_v22, %v621_v42  ;;  %v682_v52 = vadd.f32 %v678_v11, %v622_v43 }
  0xe0   :  { %v735_v45 = vadd.f32 %v731_v19, %v1542_v37  ;;  %923 = vlog2.f32 %v737_v40  ;;  %v676_v46 = vadd.f32 %v672_v1, %v664_v55  ;;  %v683_v3 = vadd.f32 %v679_v5, %v623_v58 }
  0xe1   :  { %v738_v10 = vadd.f32 1e-10, %v734_v60  ;;  %v914_v53 = vpop.eup %913  ;;  %vm685_vm1 = vcmp.ne.f32.partialorder %v681_v2, %v681_v2  ;;  %vm752_vm2 = vcmp.le.f32.partialorder %v1602_v18, 1e-08  ;;  %vm686_vm3 = vcmp.ne.f32.partialorder %v682_v52, %v682_v52 }
  0xe2   :  { %v739_v56 = vadd.f32 1e-10, %v735_v45  ;;  %v916_v50 = vpop.eup %915  ;;  %v680_v20 = vadd.f32 %v676_v46, %v620_v27  ;;  %v701_v57 = vmul.f32 0.6931472, %v914_v53  ;;  %vm753_vm4 = vcmp.le.f32.partialorder %v1606_v44, 1e-08 }
  0xe3   :  { %925 = vlog2.f32 %v738_v10  ;;  %v918_v15 = vpop.eup %917  ;;  %vm754_vm5 = vcmp.le.f32.partialorder %v935_v49, 1e-08  ;;  %vm687_vm6 = vcmp.ne.f32.partialorder %v683_v3, %v683_v3  ;;  %v703_v17 = vmul.f32 0.6931472, %v916_v50 }
  0xe4   :  { %927 = vlog2.f32 %v739_v56  ;;  %v920_v4 = vpop.eup %919  ;;  %vm684_vm0 = vcmp.ne.f32.partialorder %v680_v20, %v680_v20  ;;  %vm755_vm7 = vcmp.le.f32.partialorder %v936_v47, 1e-08  ;;  %v689_v59 = vsel %vm685_vm1, inf, %v681_v2 }
  0xe5   :  { %v688_v29 = vsel %vm684_vm0, inf, %v680_v20  ;;  %v705_v28 = vmul.f32 0.6931472, %v918_v15  ;;  %v760_v6 = vmul.f32 %v1533_v0, %v1533_v0  ;;  %v690_v63 = vsel %vm686_vm3, inf, %v682_v52 }
  0xe6   :  { %v707_v14 = vmul.f32 0.6931472, %v920_v4  ;;  %v761_v16 = vmul.f32 %v1538_v33, %v1538_v33  ;;  %v691_v24 = vsel %vm687_vm6, inf, %v683_v3  ;;  %v708_v32 = vsub.f32 %v688_v29, %v701_v57 }
  0xe7   :  { %v709_v36 = vsub.f32 %v689_v59, %v703_v17  ;;  %v762_v9 = vmul.f32 %v1540_v25, %v1540_v25  ;;  %v710_v60 = vsub.f32 %v690_v63, %v705_v28  ;;  %v763_v34 = vmul.f32 %v1542_v37, %v1542_v37 }
  0xe8   :  { %v711_v33 = vsub.f32 %v691_v24, %v707_v14 }
  0xec   :  { %v922_v61 = vpop.eup %921 }
  0xed   :  { %v924_v54 = vpop.eup %923  ;;  %v741_v21 = vmul.f32 0.6931472, %v922_v61 }
  0xee   :  { %v743_v41 = vmul.f32 0.6931472, %v924_v54 }
  0xef   :  { %v748_v19 = vsub.f32 0.0, %v741_v21 }
  0xf0   :  { %v926_v8 = vpop.eup %925  ;;  %v749_v55 = vsub.f32 0.0, %v743_v41 }
  0xf1   :  { %v928_v62 = vpop.eup %927  ;;  %v745_v30 = vmul.f32 0.6931472, %v926_v8  ;;  %v756_v26 = vsel %vm752_vm2, %v748_v19, %v708_v32 }
  0xf2   :  { %v747_v35 = vmul.f32 0.6931472, %v928_v62  ;;  %v757_v48 = vsel %vm753_vm4, %v749_v55, %v709_v36  ;;  %v764_v7 = vadd.f32 %v760_v6, %v756_v26 }
  0xf3   :  { %v750_v0 = vsub.f32 0.0, %v745_v30  ;;  %v765_v25 = vadd.f32 %v761_v16, %v757_v48 }
  0xf4   :  { %v751_v23 = vsub.f32 0.0, %v747_v35 }
  0xf5   :  { %v758_v45 = vsel %vm754_vm5, %v750_v0, %v710_v60 }
  0xf6   :  { %v759_v40 = vsel %vm755_vm7, %v751_v23, %v711_v33  ;;  %v766_v39 = vadd.f32 %v762_v9, %v758_v45 }
  0xf7   :  { %v767_v1 = vadd.f32 %v763_v34, %v759_v40 }
  0xf8   :  { %v770_v10 = vadd.f32 %v766_v39, %v764_v7 }
  0xf9   :  { %v771_v18 = vadd.f32 %v767_v1, %v765_v25 }
  0xfb   :  { %v773_v13 = vadd.f32 %v771_v18, %v770_v10 }
  0xfd   :  { %774 = vst [vmem:[#allocation10] sm:$0xff] %v773_v13 }
  0xfe   :  { %1028 = shalt.err (!%p1025_p10)
}
  0xff   :  { %784 = dma.vmem_to_hbm [thread:$0]  %s782_s4, 128, %s1633_s5, [#allocation4]  }
 0x100   :  { %1043 = dma.done.wait [#allocation4], 128  }
 0x101   :  { %1044 = vsyncadd [#allocation4], 4294967168 }
 0x102   :  { %788 = vsyncpa [#allocation3], 1 }
 0x103   :  { %789 = vsyncpa [#allocation6], 1 }
 0x104   :  { %790 = vsyncpa [#allocation9], 1 }
 0x105   :  { %791 = vsyncpa [#allocation4], 1 }

</bundles_post_ra>
